<compile_context>
chip_gen: v7x
topology: tpu7x:2x2x1
jax: 0.10.0
libtpu: 0.0.40
codegen_flags: <defaults>
</compile_context>

<pallas_src>
import jax
import jax.numpy as jnp
import numpy as np
from jax.experimental import pallas as pl
from jax.experimental.pallas import tpu as pltpu

# ----------------------------------------------------------------------------
# Model scalar hyper-parameters (the scalars passed to __init__).
# ----------------------------------------------------------------------------
B_MINOR = 0.5
B_BAR_MINOR = 0.3
C_MINOR = 0.8
Q_MINOR = 0.2
SIGMA = 0.25
B_F = 1.1
K_COEF = 0.6
C_F = 0.9
BN_EPS = 1e-5


# ----------------------------------------------------------------------------
# Pallas kernel: entire time recursion in one invocation.
# ----------------------------------------------------------------------------
def mfg_minor_kernel(
    # SMEM: packed per-step scalars, shape (6, N):
    #   rows = [h, x_bar, eta, path_major, grad_major, dW_major]
    scal_ref,
    # VMEM inputs (all fully resident)
    x0_ref,                       # (B, D)        initial state
    xi_ref,                       # (N, 1, D)     Brownian increments
    v0_ref, gv0_ref,              # (1, D) each   v0 and grad_v0 parameters
    w1_ref, b1_ref, g1_ref, be1_ref,   # i_h1[t]  : (L,D,H),(L,1,H),(L,1,H),(L,1,H)
    w2_ref, b2_ref, g2_ref, be2_ref,   # h1_h2[t] : (L,H,H),(L,1,H),(L,1,H),(L,1,H)
    w3_ref, b3_ref,                    # h2_o[t]  : (L,H,D),(L,1,D)       L = N-1
    # outputs
    v_out,                        # (B, D)
    x_out,                        # (B, D)
    path_out,                     # (N+1, B, D)
):
    N = xi_ref.shape[0]
    B, D = x0_ref.shape

    def read_scalars(t):
        return (scal_ref[0, t], scal_ref[1, t], scal_ref[2, t],
                scal_ref[3, t], scal_ref[4, t], scal_ref[5, t])

    def sde_update(x, v_base, grad, h, xbar, eta, pm, gm, dwm, xi):
        alpha = (-C_MINOR / C_F) * grad
        drift = B_F * x - B_BAR_MINOR * xbar - K_COEF * pm - eta
        f = 0.5 * drift * drift + 0.5 * C_F * alpha * alpha
        v_new = v_base - f * h + grad * (SIGMA * xi) + gm * SIGMA * dwm
        x_new = (B_MINOR * x + Q_MINOR * pm + B_BAR_MINOR * xbar
                 + C_MINOR * alpha) * h + SIGMA * xi
        return x_new, v_new

    def bn_relu(z, gamma, beta):
        # BatchNorm1d (training mode): batch stats, biased variance; fused
        # single pass over z: var = E[z^2] - E[z]^2.
        mu = jnp.mean(z, axis=0, keepdims=True)
        ms = jnp.mean(z * z, axis=0, keepdims=True)
        var = ms - mu * mu
        zn = (z - mu) * jax.lax.rsqrt(var + BN_EPS)
        return jnp.maximum(gamma * zn + beta, 0.0)

    # --- step 0 (peeled): uses v0 / grad_v0 parameters, no MLP ---------------
    x0 = x0_ref[...]
    path_out[pl.ds(0, 1), :, :] = x0[None]
    h, xbar, eta, pm, gm, dwm = read_scalars(0)
    xi0 = xi_ref[0]                        # (1, D), broadcasts against (B, D)
    grad0 = gv0_ref[...]                   # (1, D)
    v_base0 = v0_ref[...]                  # (1, D)
    x, v = sde_update(x0, v_base0, grad0, h, xbar, eta, pm, gm, dwm, xi0)
    path_out[pl.ds(1, 1), :, :] = x[None]

    # --- steps 1 .. N-1: per-step stacked MLP gives grad ---------------------
    def body(t, carry):
        x, v = carry
        h, xbar, eta, pm, gm, dwm = read_scalars(t)
        xi = xi_ref[t]                     # (1, D)
        j = t - 1                          # layer slot (timegrid[1:-1])

        z1 = jnp.dot(x, w1_ref[j], preferred_element_type=jnp.float32) + b1_ref[j]
        h1 = bn_relu(z1, g1_ref[j], be1_ref[j])
        z2 = jnp.dot(h1, w2_ref[j], preferred_element_type=jnp.float32) + b2_ref[j]
        h2 = bn_relu(z2, g2_ref[j], be2_ref[j])
        grad = jnp.dot(h2, w3_ref[j], preferred_element_type=jnp.float32) + b3_ref[j]

        x_new, v_new = sde_update(x, v, grad, h, xbar, eta, pm, gm, dwm, xi)
        path_out[pl.ds(t + 1, 1), :, :] = x_new[None]
        return (x_new, v_new)

    x, v = jax.lax.fori_loop(1, N, body, (x, v), unroll=True)

    v_out[...] = v
    x_out[...] = x


# ----------------------------------------------------------------------------
# Wrapper
# ----------------------------------------------------------------------------
def mfg_minor_forward(x0, params):
    """Returns (v, x_T, path) like Net_stacked_minor.forward."""
    N = params["scal"].shape[1]
    B, D = x0.shape

    smem = pl.BlockSpec(memory_space=pltpu.MemorySpace.SMEM)
    vmem = pl.BlockSpec(memory_space=pltpu.MemorySpace.VMEM)

    in_specs = [smem] + [vmem] * 14
    out_specs = (vmem, vmem, vmem)
    out_shape = (
        jax.ShapeDtypeStruct((B, D), jnp.float32),          # v
        jax.ShapeDtypeStruct((B, D), jnp.float32),          # x_T
        jax.ShapeDtypeStruct((N + 1, B, D), jnp.float32),   # path (incl. x0)
    )

    v, x_T, path = pl.pallas_call(
        mfg_minor_kernel,
        in_specs=in_specs,
        out_specs=out_specs,
        out_shape=out_shape,
    )(
        params["scal"],
        x0, params["xi"], params["v0"], params["gv0"],
        params["w1"], params["b1"], params["g1"], params["be1"],
        params["w2"], params["b2"], params["g2"], params["be2"],
        params["w3"], params["b3"],
    )
    return v, x_T, path


# ----------------------------------------------------------------------------
# Pure-JAX reference (mirror of the torch forward) for correctness checking.
# ----------------------------------------------------------------------------
def reference_forward(x0, params):
    scal = params["scal"]
    N = scal.shape[1]
    h_a, xbar_a, eta_a, pm_a, gm_a, dwm_a = (scal[k] for k in range(6))
    x = x0
    v = None
    path = [x0]

    def bn_relu(z, gamma, beta):
        mu = jnp.mean(z, axis=0, keepdims=True)
        var = jnp.mean((z - mu) ** 2, axis=0, keepdims=True)
        return jnp.maximum(gamma * (z - mu) / jnp.sqrt(var + BN_EPS) + beta, 0.0)

    for i in range(N):
        h, xbar, eta = h_a[i], xbar_a[i], eta_a[i]
        pm, gm, dwm = pm_a[i], gm_a[i], dwm_a[i]
        xi = params["xi"][i]
        if i == 0:
            grad = params["gv0"]
            v_base = params["v0"]
        else:
            j = i - 1
            z1 = x @ params["w1"][j] + params["b1"][j]
            h1 = bn_relu(z1, params["g1"][j], params["be1"][j])
            z2 = h1 @ params["w2"][j] + params["b2"][j]
            h2 = bn_relu(z2, params["g2"][j], params["be2"][j])
            grad = h2 @ params["w3"][j] + params["b3"][j]
            v_base = v
        alpha = (-C_MINOR / C_F) * grad
        drift = B_F * x - B_BAR_MINOR * xbar - K_COEF * pm - eta
        f = 0.5 * drift * drift + 0.5 * C_F * alpha * alpha
        v = v_base - f * h + grad * (SIGMA * xi) + gm * SIGMA * dwm
        x = (B_MINOR * x + Q_MINOR * pm + B_BAR_MINOR * xbar
             + C_MINOR * alpha) * h + SIGMA * xi
        path.append(x)
    return v, x, jnp.stack(path)


# ----------------------------------------------------------------------------
# Deterministic parameter / input construction.
# ----------------------------------------------------------------------------
def build_params(key, N, D, H):
    ks = jax.random.split(key, 12)
    f32 = jnp.float32
    timegrid = jnp.linspace(0.0, 1.0, N + 1, dtype=f32)
    h = timegrid[1:] - timegrid[:-1]                               # (N,)
    xi = jnp.sqrt(h)[:, None, None] * jax.random.normal(ks[0], (N, 1, D), f32)
    xbar = 0.1 * jnp.arange(N, dtype=f32)                          # x_bar[i]
    eta = 0.05 * jnp.ones((N,), f32)                               # eta[i]
    # synthesized net_major per-step outputs (see TODO at top):
    pm = 0.2 * jax.random.normal(ks[1], (N,), f32)                 # path_major[i]
    gm = 0.2 * jax.random.normal(ks[2], (N,), f32)                 # grad_major[i]
    dwm = jnp.sqrt(h) * jax.random.normal(ks[3], (N,), f32)        # dW_major[i]
    scal = jnp.stack([h, xbar, eta, pm, gm, dwm], axis=0)          # (6, N) SMEM pack

    L = N - 1   # number of per-step MLPs (one per t in timegrid[1:-1])
    params = {
        "scal": scal,
        "xi": xi,
        "v0": jax.random.normal(ks[4], (1, D), f32),               # nn.Parameter v0
        "gv0": jax.random.normal(ks[5], (1, D), f32),              # nn.Parameter grad_v0
        # stacked per-step MLP weights, stored (in_features, out_features)
        "w1": 0.3 * jax.random.normal(ks[6], (L, D, H), f32),
        "b1": 0.1 * jax.random.normal(ks[7], (L, 1, H), f32),
        "g1": jnp.ones((L, 1, H), f32),                            # BN weight (default 1)
        "be1": jnp.zeros((L, 1, H), f32),                          # BN bias   (default 0)
        "w2": 0.3 * jax.random.normal(ks[8], (L, H, H), f32),
        "b2": 0.1 * jax.random.normal(ks[9], (L, 1, H), f32),
        "g2": jnp.ones((L, 1, H), f32),
        "be2": jnp.zeros((L, 1, H), f32),
        "w3": 0.3 * jax.random.normal(ks[10], (L, H, D), f32),
        "b3": 0.1 * jax.random.normal(ks[11], (L, 1, D), f32),
    }
    return params


if __name__ == "__main__":
    key = jax.random.PRNGKey(0)
    B, D = 16, 8         # batch, dim
    H = D + 10           # hidden width (dim + 10)
    T = 6                # len(timegrid)
    N = T - 1            # number of time steps

    k_x, k_p = jax.random.split(key)
    x0 = jax.random.normal(k_x, (B, D), jnp.float32)
    params = build_params(k_p, N, D, H)

    v, x_T, path = mfg_minor_forward(x0, params)
    jax.block_until_ready((v, x_T, path))

    v_ref, x_ref, path_ref = reference_forward(x0, params)
    np.testing.assert_allclose(np.asarray(v), np.asarray(v_ref), rtol=1e-3, atol=1e-3)
    np.testing.assert_allclose(np.asarray(x_T), np.asarray(x_ref), rtol=1e-3, atol=1e-3)
    np.testing.assert_allclose(np.asarray(path), np.asarray(path_ref), rtol=1e-3, atol=1e-3)

    print("KERNEL_OK")
</pallas_src>

<mosaic_0001>
module attributes {stable_mosaic.version = 11 : i64} {
  func.func @mfg_minor_kernel(%arg0: memref<6x5xf32, #tpu.memory_space<smem>>, %arg1: memref<16x8xf32, #tpu.memory_space<vmem>>, %arg2: memref<5x1x8xf32, #tpu.memory_space<vmem>>, %arg3: memref<1x8xf32, #tpu.memory_space<vmem>>, %arg4: memref<1x8xf32, #tpu.memory_space<vmem>>, %arg5: memref<4x8x18xf32, #tpu.memory_space<vmem>>, %arg6: memref<4x1x18xf32, #tpu.memory_space<vmem>>, %arg7: memref<4x1x18xf32, #tpu.memory_space<vmem>>, %arg8: memref<4x1x18xf32, #tpu.memory_space<vmem>>, %arg9: memref<4x18x18xf32, #tpu.memory_space<vmem>>, %arg10: memref<4x1x18xf32, #tpu.memory_space<vmem>>, %arg11: memref<4x1x18xf32, #tpu.memory_space<vmem>>, %arg12: memref<4x1x18xf32, #tpu.memory_space<vmem>>, %arg13: memref<4x18x8xf32, #tpu.memory_space<vmem>>, %arg14: memref<4x1x8xf32, #tpu.memory_space<vmem>>, %arg15: memref<16x8xf32, #tpu.memory_space<vmem>>, %arg16: memref<16x8xf32, #tpu.memory_space<vmem>>, %arg17: memref<6x16x8xf32, #tpu.memory_space<vmem>>) attributes {dimension_semantics = [], scalar_prefetch = 0 : i64, scratch_operands = 0 : i64, tpu.core_type = #tpu.core_type<tc>} {
    %c0 = arith.constant 0 : index
    %c0_0 = arith.constant 0 : index
    %0 = vector.load %arg1[%c0, %c0_0] : memref<16x8xf32, #tpu.memory_space<vmem>>, vector<16x8xf32>
    %1 = vector.shape_cast %0 : vector<16x8xf32> to vector<1x16x8xf32>
    %c0_1 = arith.constant 0 : index
    %c0_2 = arith.constant 0 : index
    %c0_3 = arith.constant 0 : index
    %2 = vector.load %arg17[%c0_1, %c0_2, %c0_3] : memref<6x16x8xf32, #tpu.memory_space<vmem>>, vector<1x16x8xf32>
    tpu.vector_store %arg17[%c0_1, %c0_2, %c0_3], %1 {strides = array<i32>} : memref<6x16x8xf32, #tpu.memory_space<vmem>>, vector<1x16x8xf32>,
    %c0_4 = arith.constant 0 : index
    %c0_5 = arith.constant 0 : index
    %3 = memref.load %arg0[%c0_4, %c0_5] : memref<6x5xf32, #tpu.memory_space<smem>>
    %c1 = arith.constant 1 : index
    %c0_6 = arith.constant 0 : index
    %4 = memref.load %arg0[%c1, %c0_6] : memref<6x5xf32, #tpu.memory_space<smem>>
    %c2 = arith.constant 2 : index
    %c0_7 = arith.constant 0 : index
    %5 = memref.load %arg0[%c2, %c0_7] : memref<6x5xf32, #tpu.memory_space<smem>>
    %c3 = arith.constant 3 : index
    %c0_8 = arith.constant 0 : index
    %6 = memref.load %arg0[%c3, %c0_8] : memref<6x5xf32, #tpu.memory_space<smem>>
    %c4 = arith.constant 4 : index
    %c0_9 = arith.constant 0 : index
    %7 = memref.load %arg0[%c4, %c0_9] : memref<6x5xf32, #tpu.memory_space<smem>>
    %c5 = arith.constant 5 : index
    %c0_10 = arith.constant 0 : index
    %8 = memref.load %arg0[%c5, %c0_10] : memref<6x5xf32, #tpu.memory_space<smem>>
    %c0_11 = arith.constant 0 : index
    %c0_12 = arith.constant 0 : index
    %c0_13 = arith.constant 0 : index
    %9 = vector.load %arg2[%c0_11, %c0_12, %c0_13] : memref<5x1x8xf32, #tpu.memory_space<vmem>>, vector<1x1x8xf32>
    %10 = vector.shape_cast %9 : vector<1x1x8xf32> to vector<1x8xf32>
    %c0_14 = arith.constant 0 : index
    %c0_15 = arith.constant 0 : index
    %11 = vector.load %arg4[%c0_14, %c0_15] : memref<1x8xf32, #tpu.memory_space<vmem>>, vector<1x8xf32>
    %c0_16 = arith.constant 0 : index
    %c0_17 = arith.constant 0 : index
    %12 = vector.load %arg3[%c0_16, %c0_17] : memref<1x8xf32, #tpu.memory_space<vmem>>, vector<1x8xf32>
    %cst = arith.constant -0.888888895 : f32
    %13 = vector.broadcast %cst : f32 to vector<1x8xf32>
    %14 = arith.mulf %13, %11 : vector<1x8xf32>
    %cst_18 = arith.constant 1.100000e+00 : f32
    %15 = vector.broadcast %cst_18 : f32 to vector<16x8xf32>
    %16 = arith.mulf %15, %0 : vector<16x8xf32>
    %cst_19 = arith.constant 3.000000e-01 : f32
    %17 = arith.mulf %cst_19, %4 : f32
    %18 = vector.broadcast %17 : f32 to vector<16x8xf32>
    %19 = arith.subf %16, %18 : vector<16x8xf32>
    %cst_20 = arith.constant 6.000000e-01 : f32
    %20 = arith.mulf %cst_20, %6 : f32
    %21 = vector.broadcast %20 : f32 to vector<16x8xf32>
    %22 = arith.subf %19, %21 : vector<16x8xf32>
    %23 = vector.broadcast %5 : f32 to vector<16x8xf32>
    %24 = arith.subf %22, %23 : vector<16x8xf32>
    %cst_21 = arith.constant 5.000000e-01 : f32
    %25 = vector.broadcast %cst_21 : f32 to vector<16x8xf32>
    %26 = arith.mulf %25, %24 : vector<16x8xf32>
    %27 = arith.mulf %26, %24 : vector<16x8xf32>
    %cst_22 = arith.constant 4.500000e-01 : f32
    %28 = vector.broadcast %cst_22 : f32 to vector<1x8xf32>
    %29 = arith.mulf %28, %14 : vector<1x8xf32>
    %30 = arith.mulf %29, %14 : vector<1x8xf32>
    %31 = vector.broadcast %30 : vector<1x8xf32> to vector<16x8xf32>
    %32 = arith.addf %27, %31 : vector<16x8xf32>
    %33 = vector.broadcast %3 : f32 to vector<16x8xf32>
    %34 = arith.mulf %32, %33 : vector<16x8xf32>
    %35 = vector.broadcast %12 : vector<1x8xf32> to vector<16x8xf32>
    %36 = arith.subf %35, %34 : vector<16x8xf32>
    %cst_23 = arith.constant 2.500000e-01 : f32
    %37 = vector.broadcast %cst_23 : f32 to vector<1x8xf32>
    %38 = arith.mulf %37, %10 : vector<1x8xf32>
    %39 = arith.mulf %11, %38 : vector<1x8xf32>
    %40 = vector.broadcast %39 : vector<1x8xf32> to vector<16x8xf32>
    %41 = arith.addf %36, %40 : vector<16x8xf32>
    %cst_24 = arith.constant 2.500000e-01 : f32
    %42 = arith.mulf %7, %cst_24 : f32
    %43 = arith.mulf %42, %8 : f32
    %44 = vector.broadcast %43 : f32 to vector<16x8xf32>
    %45 = arith.addf %41, %44 : vector<16x8xf32>
    %cst_25 = arith.constant 5.000000e-01 : f32
    %46 = vector.broadcast %cst_25 : f32 to vector<16x8xf32>
    %47 = arith.mulf %46, %0 : vector<16x8xf32>
    %cst_26 = arith.constant 2.000000e-01 : f32
    %48 = arith.mulf %cst_26, %6 : f32
    %49 = vector.broadcast %48 : f32 to vector<16x8xf32>
    %50 = arith.addf %47, %49 : vector<16x8xf32>
    %cst_27 = arith.constant 3.000000e-01 : f32
    %51 = arith.mulf %cst_27, %4 : f32
    %52 = vector.broadcast %51 : f32 to vector<16x8xf32>
    %53 = arith.addf %50, %52 : vector<16x8xf32>
    %cst_28 = arith.constant 8.000000e-01 : f32
    %54 = vector.broadcast %cst_28 : f32 to vector<1x8xf32>
    %55 = arith.mulf %54, %14 : vector<1x8xf32>
    %56 = vector.broadcast %55 : vector<1x8xf32> to vector<16x8xf32>
    %57 = arith.addf %53, %56 : vector<16x8xf32>
    %58 = vector.broadcast %3 : f32 to vector<16x8xf32>
    %59 = arith.mulf %57, %58 : vector<16x8xf32>
    %cst_29 = arith.constant 2.500000e-01 : f32
    %60 = vector.broadcast %cst_29 : f32 to vector<1x8xf32>
    %61 = arith.mulf %60, %10 : vector<1x8xf32>
    %62 = vector.broadcast %61 : vector<1x8xf32> to vector<16x8xf32>
    %63 = arith.addf %59, %62 : vector<16x8xf32>
    %64 = vector.shape_cast %63 : vector<16x8xf32> to vector<1x16x8xf32>
    %c1_30 = arith.constant 1 : index
    %c0_31 = arith.constant 0 : index
    %c0_32 = arith.constant 0 : index
    %65 = vector.load %arg17[%c1_30, %c0_31, %c0_32] : memref<6x16x8xf32, #tpu.memory_space<vmem>>, vector<1x16x8xf32>
    tpu.vector_store %arg17[%c1_30, %c0_31, %c0_32], %64 {strides = array<i32>} : memref<6x16x8xf32, #tpu.memory_space<vmem>>, vector<1x16x8xf32>,
    %c1_i32 = arith.constant 1 : i32
    %c0_33 = arith.constant 0 : index
    %66 = arith.index_cast %c1_i32 : i32 to index
    %67 = memref.load %arg0[%c0_33, %66] : memref<6x5xf32, #tpu.memory_space<smem>>
    %c1_34 = arith.constant 1 : index
    %68 = arith.index_cast %c1_i32 : i32 to index
    %69 = memref.load %arg0[%c1_34, %68] : memref<6x5xf32, #tpu.memory_space<smem>>
    %c2_35 = arith.constant 2 : index
    %70 = arith.index_cast %c1_i32 : i32 to index
    %71 = memref.load %arg0[%c2_35, %70] : memref<6x5xf32, #tpu.memory_space<smem>>
    %c3_36 = arith.constant 3 : index
    %72 = arith.index_cast %c1_i32 : i32 to index
    %73 = memref.load %arg0[%c3_36, %72] : memref<6x5xf32, #tpu.memory_space<smem>>
    %c4_37 = arith.constant 4 : index
    %74 = arith.index_cast %c1_i32 : i32 to index
    %75 = memref.load %arg0[%c4_37, %74] : memref<6x5xf32, #tpu.memory_space<smem>>
    %c5_38 = arith.constant 5 : index
    %76 = arith.index_cast %c1_i32 : i32 to index
    %77 = memref.load %arg0[%c5_38, %76] : memref<6x5xf32, #tpu.memory_space<smem>>
    %78 = arith.index_cast %c1_i32 : i32 to index
    %c0_39 = arith.constant 0 : index
    %c0_40 = arith.constant 0 : index
    %79 = vector.load %arg2[%78, %c0_39, %c0_40] : memref<5x1x8xf32, #tpu.memory_space<vmem>>, vector<1x1x8xf32>
    %80 = vector.shape_cast %79 : vector<1x1x8xf32> to vector<1x8xf32>
    %c1_i32_41 = arith.constant 1 : i32
    %81 = arith.subi %c1_i32, %c1_i32_41 : i32
    %82 = arith.index_cast %81 : i32 to index
    %c0_42 = arith.constant 0 : index
    %c0_43 = arith.constant 0 : index
    %83 = vector.load %arg5[%82, %c0_42, %c0_43] : memref<4x8x18xf32, #tpu.memory_space<vmem>>, vector<1x8x18xf32>
    %84 = vector.shape_cast %83 : vector<1x8x18xf32> to vector<8x18xf32>
    %cst_44 = arith.constant dense<0.000000e+00> : vector<16x18xf32>
    %85 = tpu.matmul %63, %84, %cst_44 {dimension_numbers = #tpu.dot_dimension_numbers<[1], [0], [0], [1], [0, 0, 1, 1], [], []>} : vector<16x8xf32>, vector<8x18xf32>, vector<16x18xf32> -> vector<16x18xf32>
    %86 = arith.index_cast %81 : i32 to index
    %c0_45 = arith.constant 0 : index
    %c0_46 = arith.constant 0 : index
    %87 = vector.load %arg6[%86, %c0_45, %c0_46] : memref<4x1x18xf32, #tpu.memory_space<vmem>>, vector<1x1x18xf32>
    %88 = vector.shape_cast %87 : vector<1x1x18xf32> to vector<1x18xf32>
    %89 = vector.broadcast %88 : vector<1x18xf32> to vector<16x18xf32>
    %90 = arith.addf %85, %89 : vector<16x18xf32>
    %91 = arith.index_cast %81 : i32 to index
    %c0_47 = arith.constant 0 : index
    %c0_48 = arith.constant 0 : index
    %92 = vector.load %arg7[%91, %c0_47, %c0_48] : memref<4x1x18xf32, #tpu.memory_space<vmem>>, vector<1x1x18xf32>
    %93 = vector.shape_cast %92 : vector<1x1x18xf32> to vector<1x18xf32>
    %94 = arith.index_cast %81 : i32 to index
    %c0_49 = arith.constant 0 : index
    %c0_50 = arith.constant 0 : index
    %95 = vector.load %arg8[%94, %c0_49, %c0_50] : memref<4x1x18xf32, #tpu.memory_space<vmem>>, vector<1x1x18xf32>
    %96 = vector.shape_cast %95 : vector<1x1x18xf32> to vector<1x18xf32>
    %cst_51 = arith.constant dense<0.000000e+00> : vector<18xf32>
    %97 = vector.multi_reduction <add>, %90, %cst_51 [0] : vector<16x18xf32> to vector<18xf32>
    %98 = vector.shape_cast %97 : vector<18xf32> to vector<1x18xf32>
    %cst_52 = arith.constant 1.600000e+01 : f32
    %99 = vector.broadcast %cst_52 : f32 to vector<1x18xf32>
    %100 = arith.divf %98, %99 : vector<1x18xf32>
    %101 = arith.mulf %90, %90 : vector<16x18xf32>
    %cst_53 = arith.constant dense<0.000000e+00> : vector<18xf32>
    %102 = vector.multi_reduction <add>, %101, %cst_53 [0] : vector<16x18xf32> to vector<18xf32>
    %103 = vector.shape_cast %102 : vector<18xf32> to vector<1x18xf32>
    %cst_54 = arith.constant 1.600000e+01 : f32
    %104 = vector.broadcast %cst_54 : f32 to vector<1x18xf32>
    %105 = arith.divf %103, %104 : vector<1x18xf32>
    %106 = arith.mulf %100, %100 : vector<1x18xf32>
    %107 = arith.subf %105, %106 : vector<1x18xf32>
    %108 = vector.broadcast %100 : vector<1x18xf32> to vector<16x18xf32>
    %109 = arith.subf %90, %108 : vector<16x18xf32>
    %cst_55 = arith.constant 9.99999974E-6 : f32
    %110 = vector.broadcast %cst_55 : f32 to vector<1x18xf32>
    %111 = arith.addf %107, %110 : vector<1x18xf32>
    %112 = math.rsqrt %111 : vector<1x18xf32>
    %113 = vector.broadcast %112 : vector<1x18xf32> to vector<16x18xf32>
    %114 = arith.mulf %109, %113 : vector<16x18xf32>
    %115 = vector.broadcast %93 : vector<1x18xf32> to vector<16x18xf32>
    %116 = arith.mulf %115, %114 : vector<16x18xf32>
    %117 = vector.broadcast %96 : vector<1x18xf32> to vector<16x18xf32>
    %118 = arith.addf %116, %117 : vector<16x18xf32>
    %cst_56 = arith.constant 0.000000e+00 : f32
    %119 = vector.broadcast %cst_56 : f32 to vector<16x18xf32>
    %120 = arith.maximumf %118, %119 : vector<16x18xf32>
    %121 = arith.index_cast %81 : i32 to index
    %c0_57 = arith.constant 0 : index
    %c0_58 = arith.constant 0 : index
    %122 = vector.load %arg9[%121, %c0_57, %c0_58] : memref<4x18x18xf32, #tpu.memory_space<vmem>>, vector<1x18x18xf32>
    %123 = vector.shape_cast %122 : vector<1x18x18xf32> to vector<18x18xf32>
    %cst_59 = arith.constant dense<0.000000e+00> : vector<16x18xf32>
    %124 = tpu.matmul %120, %123, %cst_59 {dimension_numbers = #tpu.dot_dimension_numbers<[1], [0], [0], [1], [0, 0, 1, 1], [], []>} : vector<16x18xf32>, vector<18x18xf32>, vector<16x18xf32> -> vector<16x18xf32>
    %125 = arith.index_cast %81 : i32 to index
    %c0_60 = arith.constant 0 : index
    %c0_61 = arith.constant 0 : index
    %126 = vector.load %arg10[%125, %c0_60, %c0_61] : memref<4x1x18xf32, #tpu.memory_space<vmem>>, vector<1x1x18xf32>
    %127 = vector.shape_cast %126 : vector<1x1x18xf32> to vector<1x18xf32>
    %128 = vector.broadcast %127 : vector<1x18xf32> to vector<16x18xf32>
    %129 = arith.addf %124, %128 : vector<16x18xf32>
    %130 = arith.index_cast %81 : i32 to index
    %c0_62 = arith.constant 0 : index
    %c0_63 = arith.constant 0 : index
    %131 = vector.load %arg11[%130, %c0_62, %c0_63] : memref<4x1x18xf32, #tpu.memory_space<vmem>>, vector<1x1x18xf32>
    %132 = vector.shape_cast %131 : vector<1x1x18xf32> to vector<1x18xf32>
    %133 = arith.index_cast %81 : i32 to index
    %c0_64 = arith.constant 0 : index
    %c0_65 = arith.constant 0 : index
    %134 = vector.load %arg12[%133, %c0_64, %c0_65] : memref<4x1x18xf32, #tpu.memory_space<vmem>>, vector<1x1x18xf32>
    %135 = vector.shape_cast %134 : vector<1x1x18xf32> to vector<1x18xf32>
    %cst_66 = arith.constant dense<0.000000e+00> : vector<18xf32>
    %136 = vector.multi_reduction <add>, %129, %cst_66 [0] : vector<16x18xf32> to vector<18xf32>
    %137 = vector.shape_cast %136 : vector<18xf32> to vector<1x18xf32>
    %cst_67 = arith.constant 1.600000e+01 : f32
    %138 = vector.broadcast %cst_67 : f32 to vector<1x18xf32>
    %139 = arith.divf %137, %138 : vector<1x18xf32>
    %140 = arith.mulf %129, %129 : vector<16x18xf32>
    %cst_68 = arith.constant dense<0.000000e+00> : vector<18xf32>
    %141 = vector.multi_reduction <add>, %140, %cst_68 [0] : vector<16x18xf32> to vector<18xf32>
    %142 = vector.shape_cast %141 : vector<18xf32> to vector<1x18xf32>
    %cst_69 = arith.constant 1.600000e+01 : f32
    %143 = vector.broadcast %cst_69 : f32 to vector<1x18xf32>
    %144 = arith.divf %142, %143 : vector<1x18xf32>
    %145 = arith.mulf %139, %139 : vector<1x18xf32>
    %146 = arith.subf %144, %145 : vector<1x18xf32>
    %147 = vector.broadcast %139 : vector<1x18xf32> to vector<16x18xf32>
    %148 = arith.subf %129, %147 : vector<16x18xf32>
    %cst_70 = arith.constant 9.99999974E-6 : f32
    %149 = vector.broadcast %cst_70 : f32 to vector<1x18xf32>
    %150 = arith.addf %146, %149 : vector<1x18xf32>
    %151 = math.rsqrt %150 : vector<1x18xf32>
    %152 = vector.broadcast %151 : vector<1x18xf32> to vector<16x18xf32>
    %153 = arith.mulf %148, %152 : vector<16x18xf32>
    %154 = vector.broadcast %132 : vector<1x18xf32> to vector<16x18xf32>
    %155 = arith.mulf %154, %153 : vector<16x18xf32>
    %156 = vector.broadcast %135 : vector<1x18xf32> to vector<16x18xf32>
    %157 = arith.addf %155, %156 : vector<16x18xf32>
    %cst_71 = arith.constant 0.000000e+00 : f32
    %158 = vector.broadcast %cst_71 : f32 to vector<16x18xf32>
    %159 = arith.maximumf %157, %158 : vector<16x18xf32>
    %160 = arith.index_cast %81 : i32 to index
    %c0_72 = arith.constant 0 : index
    %c0_73 = arith.constant 0 : index
    %161 = vector.load %arg13[%160, %c0_72, %c0_73] : memref<4x18x8xf32, #tpu.memory_space<vmem>>, vector<1x18x8xf32>
    %162 = vector.shape_cast %161 : vector<1x18x8xf32> to vector<18x8xf32>
    %cst_74 = arith.constant dense<0.000000e+00> : vector<16x8xf32>
    %163 = tpu.matmul %159, %162, %cst_74 {dimension_numbers = #tpu.dot_dimension_numbers<[1], [0], [0], [1], [0, 0, 1, 1], [], []>} : vector<16x18xf32>, vector<18x8xf32>, vector<16x8xf32> -> vector<16x8xf32>
    %164 = arith.index_cast %81 : i32 to index
    %c0_75 = arith.constant 0 : index
    %c0_76 = arith.constant 0 : index
    %165 = vector.load %arg14[%164, %c0_75, %c0_76] : memref<4x1x8xf32, #tpu.memory_space<vmem>>, vector<1x1x8xf32>
    %166 = vector.shape_cast %165 : vector<1x1x8xf32> to vector<1x8xf32>
    %167 = vector.broadcast %166 : vector<1x8xf32> to vector<16x8xf32>
    %168 = arith.addf %163, %167 : vector<16x8xf32>
    %cst_77 = arith.constant -0.888888895 : f32
    %169 = vector.broadcast %cst_77 : f32 to vector<16x8xf32>
    %170 = arith.mulf %169, %168 : vector<16x8xf32>
    %cst_78 = arith.constant 1.100000e+00 : f32
    %171 = vector.broadcast %cst_78 : f32 to vector<16x8xf32>
    %172 = arith.mulf %171, %63 : vector<16x8xf32>
    %cst_79 = arith.constant 3.000000e-01 : f32
    %173 = arith.mulf %cst_79, %69 : f32
    %174 = vector.broadcast %173 : f32 to vector<16x8xf32>
    %175 = arith.subf %172, %174 : vector<16x8xf32>
    %cst_80 = arith.constant 6.000000e-01 : f32
    %176 = arith.mulf %cst_80, %73 : f32
    %177 = vector.broadcast %176 : f32 to vector<16x8xf32>
    %178 = arith.subf %175, %177 : vector<16x8xf32>
    %179 = vector.broadcast %71 : f32 to vector<16x8xf32>
    %180 = arith.subf %178, %179 : vector<16x8xf32>
    %cst_81 = arith.constant 5.000000e-01 : f32
    %181 = vector.broadcast %cst_81 : f32 to vector<16x8xf32>
    %182 = arith.mulf %181, %180 : vector<16x8xf32>
    %183 = arith.mulf %182, %180 : vector<16x8xf32>
    %cst_82 = arith.constant 4.500000e-01 : f32
    %184 = vector.broadcast %cst_82 : f32 to vector<16x8xf32>
    %185 = arith.mulf %184, %170 : vector<16x8xf32>
    %186 = arith.mulf %185, %170 : vector<16x8xf32>
    %187 = arith.addf %183, %186 : vector<16x8xf32>
    %188 = vector.broadcast %67 : f32 to vector<16x8xf32>
    %189 = arith.mulf %187, %188 : vector<16x8xf32>
    %190 = arith.subf %45, %189 : vector<16x8xf32>
    %cst_83 = arith.constant 2.500000e-01 : f32
    %191 = vector.broadcast %cst_83 : f32 to vector<1x8xf32>
    %192 = arith.mulf %191, %80 : vector<1x8xf32>
    %193 = vector.broadcast %192 : vector<1x8xf32> to vector<16x8xf32>
    %194 = arith.mulf %168, %193 : vector<16x8xf32>
    %195 = arith.addf %190, %194 : vector<16x8xf32>
    %cst_84 = arith.constant 2.500000e-01 : f32
    %196 = arith.mulf %75, %cst_84 : f32
    %197 = arith.mulf %196, %77 : f32
    %198 = vector.broadcast %197 : f32 to vector<16x8xf32>
    %199 = arith.addf %195, %198 : vector<16x8xf32>
    %cst_85 = arith.constant 5.000000e-01 : f32
    %200 = vector.broadcast %cst_85 : f32 to vector<16x8xf32>
    %201 = arith.mulf %200, %63 : vector<16x8xf32>
    %cst_86 = arith.constant 2.000000e-01 : f32
    %202 = arith.mulf %cst_86, %73 : f32
    %203 = vector.broadcast %202 : f32 to vector<16x8xf32>
    %204 = arith.addf %201, %203 : vector<16x8xf32>
    %cst_87 = arith.constant 3.000000e-01 : f32
    %205 = arith.mulf %cst_87, %69 : f32
    %206 = vector.broadcast %205 : f32 to vector<16x8xf32>
    %207 = arith.addf %204, %206 : vector<16x8xf32>
    %cst_88 = arith.constant 8.000000e-01 : f32
    %208 = vector.broadcast %cst_88 : f32 to vector<16x8xf32>
    %209 = arith.mulf %208, %170 : vector<16x8xf32>
    %210 = arith.addf %207, %209 : vector<16x8xf32>
    %211 = vector.broadcast %67 : f32 to vector<16x8xf32>
    %212 = arith.mulf %210, %211 : vector<16x8xf32>
    %cst_89 = arith.constant 2.500000e-01 : f32
    %213 = vector.broadcast %cst_89 : f32 to vector<1x8xf32>
    %214 = arith.mulf %213, %80 : vector<1x8xf32>
    %215 = vector.broadcast %214 : vector<1x8xf32> to vector<16x8xf32>
    %216 = arith.addf %212, %215 : vector<16x8xf32>
    %217 = vector.shape_cast %216 : vector<16x8xf32> to vector<1x16x8xf32>
    %c1_i32_90 = arith.constant 1 : i32
    %218 = arith.addi %c1_i32, %c1_i32_90 : i32
    %219 = arith.index_cast %218 : i32 to index
    %c0_91 = arith.constant 0 : index
    %c0_92 = arith.constant 0 : index
    %220 = vector.load %arg17[%219, %c0_91, %c0_92] : memref<6x16x8xf32, #tpu.memory_space<vmem>>, vector<1x16x8xf32>
    tpu.vector_store %arg17[%219, %c0_91, %c0_92], %217 {strides = array<i32>} : memref<6x16x8xf32, #tpu.memory_space<vmem>>, vector<1x16x8xf32>,
    %c2_i32 = arith.constant 2 : i32
    %c0_93 = arith.constant 0 : index
    %221 = arith.index_cast %c2_i32 : i32 to index
    %222 = memref.load %arg0[%c0_93, %221] : memref<6x5xf32, #tpu.memory_space<smem>>
    %c1_94 = arith.constant 1 : index
    %223 = arith.index_cast %c2_i32 : i32 to index
    %224 = memref.load %arg0[%c1_94, %223] : memref<6x5xf32, #tpu.memory_space<smem>>
    %c2_95 = arith.constant 2 : index
    %225 = arith.index_cast %c2_i32 : i32 to index
    %226 = memref.load %arg0[%c2_95, %225] : memref<6x5xf32, #tpu.memory_space<smem>>
    %c3_96 = arith.constant 3 : index
    %227 = arith.index_cast %c2_i32 : i32 to index
    %228 = memref.load %arg0[%c3_96, %227] : memref<6x5xf32, #tpu.memory_space<smem>>
    %c4_97 = arith.constant 4 : index
    %229 = arith.index_cast %c2_i32 : i32 to index
    %230 = memref.load %arg0[%c4_97, %229] : memref<6x5xf32, #tpu.memory_space<smem>>
    %c5_98 = arith.constant 5 : index
    %231 = arith.index_cast %c2_i32 : i32 to index
    %232 = memref.load %arg0[%c5_98, %231] : memref<6x5xf32, #tpu.memory_space<smem>>
    %233 = arith.index_cast %c2_i32 : i32 to index
    %c0_99 = arith.constant 0 : index
    %c0_100 = arith.constant 0 : index
    %234 = vector.load %arg2[%233, %c0_99, %c0_100] : memref<5x1x8xf32, #tpu.memory_space<vmem>>, vector<1x1x8xf32>
    %235 = vector.shape_cast %234 : vector<1x1x8xf32> to vector<1x8xf32>
    %c1_i32_101 = arith.constant 1 : i32
    %236 = arith.subi %c2_i32, %c1_i32_101 : i32
    %237 = arith.index_cast %236 : i32 to index
    %c0_102 = arith.constant 0 : index
    %c0_103 = arith.constant 0 : index
    %238 = vector.load %arg5[%237, %c0_102, %c0_103] : memref<4x8x18xf32, #tpu.memory_space<vmem>>, vector<1x8x18xf32>
    %239 = vector.shape_cast %238 : vector<1x8x18xf32> to vector<8x18xf32>
    %cst_104 = arith.constant dense<0.000000e+00> : vector<16x18xf32>
    %240 = tpu.matmul %216, %239, %cst_104 {dimension_numbers = #tpu.dot_dimension_numbers<[1], [0], [0], [1], [0, 0, 1, 1], [], []>} : vector<16x8xf32>, vector<8x18xf32>, vector<16x18xf32> -> vector<16x18xf32>
    %241 = arith.index_cast %236 : i32 to index
    %c0_105 = arith.constant 0 : index
    %c0_106 = arith.constant 0 : index
    %242 = vector.load %arg6[%241, %c0_105, %c0_106] : memref<4x1x18xf32, #tpu.memory_space<vmem>>, vector<1x1x18xf32>
    %243 = vector.shape_cast %242 : vector<1x1x18xf32> to vector<1x18xf32>
    %244 = vector.broadcast %243 : vector<1x18xf32> to vector<16x18xf32>
    %245 = arith.addf %240, %244 : vector<16x18xf32>
    %246 = arith.index_cast %236 : i32 to index
    %c0_107 = arith.constant 0 : index
    %c0_108 = arith.constant 0 : index
    %247 = vector.load %arg7[%246, %c0_107, %c0_108] : memref<4x1x18xf32, #tpu.memory_space<vmem>>, vector<1x1x18xf32>
    %248 = vector.shape_cast %247 : vector<1x1x18xf32> to vector<1x18xf32>
    %249 = arith.index_cast %236 : i32 to index
    %c0_109 = arith.constant 0 : index
    %c0_110 = arith.constant 0 : index
    %250 = vector.load %arg8[%249, %c0_109, %c0_110] : memref<4x1x18xf32, #tpu.memory_space<vmem>>, vector<1x1x18xf32>
    %251 = vector.shape_cast %250 : vector<1x1x18xf32> to vector<1x18xf32>
    %cst_111 = arith.constant dense<0.000000e+00> : vector<18xf32>
    %252 = vector.multi_reduction <add>, %245, %cst_111 [0] : vector<16x18xf32> to vector<18xf32>
    %253 = vector.shape_cast %252 : vector<18xf32> to vector<1x18xf32>
    %cst_112 = arith.constant 1.600000e+01 : f32
    %254 = vector.broadcast %cst_112 : f32 to vector<1x18xf32>
    %255 = arith.divf %253, %254 : vector<1x18xf32>
    %256 = arith.mulf %245, %245 : vector<16x18xf32>
    %cst_113 = arith.constant dense<0.000000e+00> : vector<18xf32>
    %257 = vector.multi_reduction <add>, %256, %cst_113 [0] : vector<16x18xf32> to vector<18xf32>
    %258 = vector.shape_cast %257 : vector<18xf32> to vector<1x18xf32>
    %cst_114 = arith.constant 1.600000e+01 : f32
    %259 = vector.broadcast %cst_114 : f32 to vector<1x18xf32>
    %260 = arith.divf %258, %259 : vector<1x18xf32>
    %261 = arith.mulf %255, %255 : vector<1x18xf32>
    %262 = arith.subf %260, %261 : vector<1x18xf32>
    %263 = vector.broadcast %255 : vector<1x18xf32> to vector<16x18xf32>
    %264 = arith.subf %245, %263 : vector<16x18xf32>
    %cst_115 = arith.constant 9.99999974E-6 : f32
    %265 = vector.broadcast %cst_115 : f32 to vector<1x18xf32>
    %266 = arith.addf %262, %265 : vector<1x18xf32>
    %267 = math.rsqrt %266 : vector<1x18xf32>
    %268 = vector.broadcast %267 : vector<1x18xf32> to vector<16x18xf32>
    %269 = arith.mulf %264, %268 : vector<16x18xf32>
    %270 = vector.broadcast %248 : vector<1x18xf32> to vector<16x18xf32>
    %271 = arith.mulf %270, %269 : vector<16x18xf32>
    %272 = vector.broadcast %251 : vector<1x18xf32> to vector<16x18xf32>
    %273 = arith.addf %271, %272 : vector<16x18xf32>
    %cst_116 = arith.constant 0.000000e+00 : f32
    %274 = vector.broadcast %cst_116 : f32 to vector<16x18xf32>
    %275 = arith.maximumf %273, %274 : vector<16x18xf32>
    %276 = arith.index_cast %236 : i32 to index
    %c0_117 = arith.constant 0 : index
    %c0_118 = arith.constant 0 : index
    %277 = vector.load %arg9[%276, %c0_117, %c0_118] : memref<4x18x18xf32, #tpu.memory_space<vmem>>, vector<1x18x18xf32>
    %278 = vector.shape_cast %277 : vector<1x18x18xf32> to vector<18x18xf32>
    %cst_119 = arith.constant dense<0.000000e+00> : vector<16x18xf32>
    %279 = tpu.matmul %275, %278, %cst_119 {dimension_numbers = #tpu.dot_dimension_numbers<[1], [0], [0], [1], [0, 0, 1, 1], [], []>} : vector<16x18xf32>, vector<18x18xf32>, vector<16x18xf32> -> vector<16x18xf32>
    %280 = arith.index_cast %236 : i32 to index
    %c0_120 = arith.constant 0 : index
    %c0_121 = arith.constant 0 : index
    %281 = vector.load %arg10[%280, %c0_120, %c0_121] : memref<4x1x18xf32, #tpu.memory_space<vmem>>, vector<1x1x18xf32>
    %282 = vector.shape_cast %281 : vector<1x1x18xf32> to vector<1x18xf32>
    %283 = vector.broadcast %282 : vector<1x18xf32> to vector<16x18xf32>
    %284 = arith.addf %279, %283 : vector<16x18xf32>
    %285 = arith.index_cast %236 : i32 to index
    %c0_122 = arith.constant 0 : index
    %c0_123 = arith.constant 0 : index
    %286 = vector.load %arg11[%285, %c0_122, %c0_123] : memref<4x1x18xf32, #tpu.memory_space<vmem>>, vector<1x1x18xf32>
    %287 = vector.shape_cast %286 : vector<1x1x18xf32> to vector<1x18xf32>
    %288 = arith.index_cast %236 : i32 to index
    %c0_124 = arith.constant 0 : index
    %c0_125 = arith.constant 0 : index
    %289 = vector.load %arg12[%288, %c0_124, %c0_125] : memref<4x1x18xf32, #tpu.memory_space<vmem>>, vector<1x1x18xf32>
    %290 = vector.shape_cast %289 : vector<1x1x18xf32> to vector<1x18xf32>
    %cst_126 = arith.constant dense<0.000000e+00> : vector<18xf32>
    %291 = vector.multi_reduction <add>, %284, %cst_126 [0] : vector<16x18xf32> to vector<18xf32>
    %292 = vector.shape_cast %291 : vector<18xf32> to vector<1x18xf32>
    %cst_127 = arith.constant 1.600000e+01 : f32
    %293 = vector.broadcast %cst_127 : f32 to vector<1x18xf32>
    %294 = arith.divf %292, %293 : vector<1x18xf32>
    %295 = arith.mulf %284, %284 : vector<16x18xf32>
    %cst_128 = arith.constant dense<0.000000e+00> : vector<18xf32>
    %296 = vector.multi_reduction <add>, %295, %cst_128 [0] : vector<16x18xf32> to vector<18xf32>
    %297 = vector.shape_cast %296 : vector<18xf32> to vector<1x18xf32>
    %cst_129 = arith.constant 1.600000e+01 : f32
    %298 = vector.broadcast %cst_129 : f32 to vector<1x18xf32>
    %299 = arith.divf %297, %298 : vector<1x18xf32>
    %300 = arith.mulf %294, %294 : vector<1x18xf32>
    %301 = arith.subf %299, %300 : vector<1x18xf32>
    %302 = vector.broadcast %294 : vector<1x18xf32> to vector<16x18xf32>
    %303 = arith.subf %284, %302 : vector<16x18xf32>
    %cst_130 = arith.constant 9.99999974E-6 : f32
    %304 = vector.broadcast %cst_130 : f32 to vector<1x18xf32>
    %305 = arith.addf %301, %304 : vector<1x18xf32>
    %306 = math.rsqrt %305 : vector<1x18xf32>
    %307 = vector.broadcast %306 : vector<1x18xf32> to vector<16x18xf32>
    %308 = arith.mulf %303, %307 : vector<16x18xf32>
    %309 = vector.broadcast %287 : vector<1x18xf32> to vector<16x18xf32>
    %310 = arith.mulf %309, %308 : vector<16x18xf32>
    %311 = vector.broadcast %290 : vector<1x18xf32> to vector<16x18xf32>
    %312 = arith.addf %310, %311 : vector<16x18xf32>
    %cst_131 = arith.constant 0.000000e+00 : f32
    %313 = vector.broadcast %cst_131 : f32 to vector<16x18xf32>
    %314 = arith.maximumf %312, %313 : vector<16x18xf32>
    %315 = arith.index_cast %236 : i32 to index
    %c0_132 = arith.constant 0 : index
    %c0_133 = arith.constant 0 : index
    %316 = vector.load %arg13[%315, %c0_132, %c0_133] : memref<4x18x8xf32, #tpu.memory_space<vmem>>, vector<1x18x8xf32>
    %317 = vector.shape_cast %316 : vector<1x18x8xf32> to vector<18x8xf32>
    %cst_134 = arith.constant dense<0.000000e+00> : vector<16x8xf32>
    %318 = tpu.matmul %314, %317, %cst_134 {dimension_numbers = #tpu.dot_dimension_numbers<[1], [0], [0], [1], [0, 0, 1, 1], [], []>} : vector<16x18xf32>, vector<18x8xf32>, vector<16x8xf32> -> vector<16x8xf32>
    %319 = arith.index_cast %236 : i32 to index
    %c0_135 = arith.constant 0 : index
    %c0_136 = arith.constant 0 : index
    %320 = vector.load %arg14[%319, %c0_135, %c0_136] : memref<4x1x8xf32, #tpu.memory_space<vmem>>, vector<1x1x8xf32>
    %321 = vector.shape_cast %320 : vector<1x1x8xf32> to vector<1x8xf32>
    %322 = vector.broadcast %321 : vector<1x8xf32> to vector<16x8xf32>
    %323 = arith.addf %318, %322 : vector<16x8xf32>
    %cst_137 = arith.constant -0.888888895 : f32
    %324 = vector.broadcast %cst_137 : f32 to vector<16x8xf32>
    %325 = arith.mulf %324, %323 : vector<16x8xf32>
    %cst_138 = arith.constant 1.100000e+00 : f32
    %326 = vector.broadcast %cst_138 : f32 to vector<16x8xf32>
    %327 = arith.mulf %326, %216 : vector<16x8xf32>
    %cst_139 = arith.constant 3.000000e-01 : f32
    %328 = arith.mulf %cst_139, %224 : f32
    %329 = vector.broadcast %328 : f32 to vector<16x8xf32>
    %330 = arith.subf %327, %329 : vector<16x8xf32>
    %cst_140 = arith.constant 6.000000e-01 : f32
    %331 = arith.mulf %cst_140, %228 : f32
    %332 = vector.broadcast %331 : f32 to vector<16x8xf32>
    %333 = arith.subf %330, %332 : vector<16x8xf32>
    %334 = vector.broadcast %226 : f32 to vector<16x8xf32>
    %335 = arith.subf %333, %334 : vector<16x8xf32>
    %cst_141 = arith.constant 5.000000e-01 : f32
    %336 = vector.broadcast %cst_141 : f32 to vector<16x8xf32>
    %337 = arith.mulf %336, %335 : vector<16x8xf32>
    %338 = arith.mulf %337, %335 : vector<16x8xf32>
    %cst_142 = arith.constant 4.500000e-01 : f32
    %339 = vector.broadcast %cst_142 : f32 to vector<16x8xf32>
    %340 = arith.mulf %339, %325 : vector<16x8xf32>
    %341 = arith.mulf %340, %325 : vector<16x8xf32>
    %342 = arith.addf %338, %341 : vector<16x8xf32>
    %343 = vector.broadcast %222 : f32 to vector<16x8xf32>
    %344 = arith.mulf %342, %343 : vector<16x8xf32>
    %345 = arith.subf %199, %344 : vector<16x8xf32>
    %cst_143 = arith.constant 2.500000e-01 : f32
    %346 = vector.broadcast %cst_143 : f32 to vector<1x8xf32>
    %347 = arith.mulf %346, %235 : vector<1x8xf32>
    %348 = vector.broadcast %347 : vector<1x8xf32> to vector<16x8xf32>
    %349 = arith.mulf %323, %348 : vector<16x8xf32>
    %350 = arith.addf %345, %349 : vector<16x8xf32>
    %cst_144 = arith.constant 2.500000e-01 : f32
    %351 = arith.mulf %230, %cst_144 : f32
    %352 = arith.mulf %351, %232 : f32
    %353 = vector.broadcast %352 : f32 to vector<16x8xf32>
    %354 = arith.addf %350, %353 : vector<16x8xf32>
    %cst_145 = arith.constant 5.000000e-01 : f32
    %355 = vector.broadcast %cst_145 : f32 to vector<16x8xf32>
    %356 = arith.mulf %355, %216 : vector<16x8xf32>
    %cst_146 = arith.constant 2.000000e-01 : f32
    %357 = arith.mulf %cst_146, %228 : f32
    %358 = vector.broadcast %357 : f32 to vector<16x8xf32>
    %359 = arith.addf %356, %358 : vector<16x8xf32>
    %cst_147 = arith.constant 3.000000e-01 : f32
    %360 = arith.mulf %cst_147, %224 : f32
    %361 = vector.broadcast %360 : f32 to vector<16x8xf32>
    %362 = arith.addf %359, %361 : vector<16x8xf32>
    %cst_148 = arith.constant 8.000000e-01 : f32
    %363 = vector.broadcast %cst_148 : f32 to vector<16x8xf32>
    %364 = arith.mulf %363, %325 : vector<16x8xf32>
    %365 = arith.addf %362, %364 : vector<16x8xf32>
    %366 = vector.broadcast %222 : f32 to vector<16x8xf32>
    %367 = arith.mulf %365, %366 : vector<16x8xf32>
    %cst_149 = arith.constant 2.500000e-01 : f32
    %368 = vector.broadcast %cst_149 : f32 to vector<1x8xf32>
    %369 = arith.mulf %368, %235 : vector<1x8xf32>
    %370 = vector.broadcast %369 : vector<1x8xf32> to vector<16x8xf32>
    %371 = arith.addf %367, %370 : vector<16x8xf32>
    %372 = vector.shape_cast %371 : vector<16x8xf32> to vector<1x16x8xf32>
    %c1_i32_150 = arith.constant 1 : i32
    %373 = arith.addi %c2_i32, %c1_i32_150 : i32
    %374 = arith.index_cast %373 : i32 to index
    %c0_151 = arith.constant 0 : index
    %c0_152 = arith.constant 0 : index
    %375 = vector.load %arg17[%374, %c0_151, %c0_152] : memref<6x16x8xf32, #tpu.memory_space<vmem>>, vector<1x16x8xf32>
    tpu.vector_store %arg17[%374, %c0_151, %c0_152], %372 {strides = array<i32>} : memref<6x16x8xf32, #tpu.memory_space<vmem>>, vector<1x16x8xf32>,
    %c3_i32 = arith.constant 3 : i32
    %c0_153 = arith.constant 0 : index
    %376 = arith.index_cast %c3_i32 : i32 to index
    %377 = memref.load %arg0[%c0_153, %376] : memref<6x5xf32, #tpu.memory_space<smem>>
    %c1_154 = arith.constant 1 : index
    %378 = arith.index_cast %c3_i32 : i32 to index
    %379 = memref.load %arg0[%c1_154, %378] : memref<6x5xf32, #tpu.memory_space<smem>>
    %c2_155 = arith.constant 2 : index
    %380 = arith.index_cast %c3_i32 : i32 to index
    %381 = memref.load %arg0[%c2_155, %380] : memref<6x5xf32, #tpu.memory_space<smem>>
    %c3_156 = arith.constant 3 : index
    %382 = arith.index_cast %c3_i32 : i32 to index
    %383 = memref.load %arg0[%c3_156, %382] : memref<6x5xf32, #tpu.memory_space<smem>>
    %c4_157 = arith.constant 4 : index
    %384 = arith.index_cast %c3_i32 : i32 to index
    %385 = memref.load %arg0[%c4_157, %384] : memref<6x5xf32, #tpu.memory_space<smem>>
    %c5_158 = arith.constant 5 : index
    %386 = arith.index_cast %c3_i32 : i32 to index
    %387 = memref.load %arg0[%c5_158, %386] : memref<6x5xf32, #tpu.memory_space<smem>>
    %388 = arith.index_cast %c3_i32 : i32 to index
    %c0_159 = arith.constant 0 : index
    %c0_160 = arith.constant 0 : index
    %389 = vector.load %arg2[%388, %c0_159, %c0_160] : memref<5x1x8xf32, #tpu.memory_space<vmem>>, vector<1x1x8xf32>
    %390 = vector.shape_cast %389 : vector<1x1x8xf32> to vector<1x8xf32>
    %c1_i32_161 = arith.constant 1 : i32
    %391 = arith.subi %c3_i32, %c1_i32_161 : i32
    %392 = arith.index_cast %391 : i32 to index
    %c0_162 = arith.constant 0 : index
    %c0_163 = arith.constant 0 : index
    %393 = vector.load %arg5[%392, %c0_162, %c0_163] : memref<4x8x18xf32, #tpu.memory_space<vmem>>, vector<1x8x18xf32>
    %394 = vector.shape_cast %393 : vector<1x8x18xf32> to vector<8x18xf32>
    %cst_164 = arith.constant dense<0.000000e+00> : vector<16x18xf32>
    %395 = tpu.matmul %371, %394, %cst_164 {dimension_numbers = #tpu.dot_dimension_numbers<[1], [0], [0], [1], [0, 0, 1, 1], [], []>} : vector<16x8xf32>, vector<8x18xf32>, vector<16x18xf32> -> vector<16x18xf32>
    %396 = arith.index_cast %391 : i32 to index
    %c0_165 = arith.constant 0 : index
    %c0_166 = arith.constant 0 : index
    %397 = vector.load %arg6[%396, %c0_165, %c0_166] : memref<4x1x18xf32, #tpu.memory_space<vmem>>, vector<1x1x18xf32>
    %398 = vector.shape_cast %397 : vector<1x1x18xf32> to vector<1x18xf32>
    %399 = vector.broadcast %398 : vector<1x18xf32> to vector<16x18xf32>
    %400 = arith.addf %395, %399 : vector<16x18xf32>
    %401 = arith.index_cast %391 : i32 to index
    %c0_167 = arith.constant 0 : index
    %c0_168 = arith.constant 0 : index
    %402 = vector.load %arg7[%401, %c0_167, %c0_168] : memref<4x1x18xf32, #tpu.memory_space<vmem>>, vector<1x1x18xf32>
    %403 = vector.shape_cast %402 : vector<1x1x18xf32> to vector<1x18xf32>
    %404 = arith.index_cast %391 : i32 to index
    %c0_169 = arith.constant 0 : index
    %c0_170 = arith.constant 0 : index
    %405 = vector.load %arg8[%404, %c0_169, %c0_170] : memref<4x1x18xf32, #tpu.memory_space<vmem>>, vector<1x1x18xf32>
    %406 = vector.shape_cast %405 : vector<1x1x18xf32> to vector<1x18xf32>
    %cst_171 = arith.constant dense<0.000000e+00> : vector<18xf32>
    %407 = vector.multi_reduction <add>, %400, %cst_171 [0] : vector<16x18xf32> to vector<18xf32>
    %408 = vector.shape_cast %407 : vector<18xf32> to vector<1x18xf32>
    %cst_172 = arith.constant 1.600000e+01 : f32
    %409 = vector.broadcast %cst_172 : f32 to vector<1x18xf32>
    %410 = arith.divf %408, %409 : vector<1x18xf32>
    %411 = arith.mulf %400, %400 : vector<16x18xf32>
    %cst_173 = arith.constant dense<0.000000e+00> : vector<18xf32>
    %412 = vector.multi_reduction <add>, %411, %cst_173 [0] : vector<16x18xf32> to vector<18xf32>
    %413 = vector.shape_cast %412 : vector<18xf32> to vector<1x18xf32>
    %cst_174 = arith.constant 1.600000e+01 : f32
    %414 = vector.broadcast %cst_174 : f32 to vector<1x18xf32>
    %415 = arith.divf %413, %414 : vector<1x18xf32>
    %416 = arith.mulf %410, %410 : vector<1x18xf32>
    %417 = arith.subf %415, %416 : vector<1x18xf32>
    %418 = vector.broadcast %410 : vector<1x18xf32> to vector<16x18xf32>
    %419 = arith.subf %400, %418 : vector<16x18xf32>
    %cst_175 = arith.constant 9.99999974E-6 : f32
    %420 = vector.broadcast %cst_175 : f32 to vector<1x18xf32>
    %421 = arith.addf %417, %420 : vector<1x18xf32>
    %422 = math.rsqrt %421 : vector<1x18xf32>
    %423 = vector.broadcast %422 : vector<1x18xf32> to vector<16x18xf32>
    %424 = arith.mulf %419, %423 : vector<16x18xf32>
    %425 = vector.broadcast %403 : vector<1x18xf32> to vector<16x18xf32>
    %426 = arith.mulf %425, %424 : vector<16x18xf32>
    %427 = vector.broadcast %406 : vector<1x18xf32> to vector<16x18xf32>
    %428 = arith.addf %426, %427 : vector<16x18xf32>
    %cst_176 = arith.constant 0.000000e+00 : f32
    %429 = vector.broadcast %cst_176 : f32 to vector<16x18xf32>
    %430 = arith.maximumf %428, %429 : vector<16x18xf32>
    %431 = arith.index_cast %391 : i32 to index
    %c0_177 = arith.constant 0 : index
    %c0_178 = arith.constant 0 : index
    %432 = vector.load %arg9[%431, %c0_177, %c0_178] : memref<4x18x18xf32, #tpu.memory_space<vmem>>, vector<1x18x18xf32>
    %433 = vector.shape_cast %432 : vector<1x18x18xf32> to vector<18x18xf32>
    %cst_179 = arith.constant dense<0.000000e+00> : vector<16x18xf32>
    %434 = tpu.matmul %430, %433, %cst_179 {dimension_numbers = #tpu.dot_dimension_numbers<[1], [0], [0], [1], [0, 0, 1, 1], [], []>} : vector<16x18xf32>, vector<18x18xf32>, vector<16x18xf32> -> vector<16x18xf32>
    %435 = arith.index_cast %391 : i32 to index
    %c0_180 = arith.constant 0 : index
    %c0_181 = arith.constant 0 : index
    %436 = vector.load %arg10[%435, %c0_180, %c0_181] : memref<4x1x18xf32, #tpu.memory_space<vmem>>, vector<1x1x18xf32>
    %437 = vector.shape_cast %436 : vector<1x1x18xf32> to vector<1x18xf32>
    %438 = vector.broadcast %437 : vector<1x18xf32> to vector<16x18xf32>
    %439 = arith.addf %434, %438 : vector<16x18xf32>
    %440 = arith.index_cast %391 : i32 to index
    %c0_182 = arith.constant 0 : index
    %c0_183 = arith.constant 0 : index
    %441 = vector.load %arg11[%440, %c0_182, %c0_183] : memref<4x1x18xf32, #tpu.memory_space<vmem>>, vector<1x1x18xf32>
    %442 = vector.shape_cast %441 : vector<1x1x18xf32> to vector<1x18xf32>
    %443 = arith.index_cast %391 : i32 to index
    %c0_184 = arith.constant 0 : index
    %c0_185 = arith.constant 0 : index
    %444 = vector.load %arg12[%443, %c0_184, %c0_185] : memref<4x1x18xf32, #tpu.memory_space<vmem>>, vector<1x1x18xf32>
    %445 = vector.shape_cast %444 : vector<1x1x18xf32> to vector<1x18xf32>
    %cst_186 = arith.constant dense<0.000000e+00> : vector<18xf32>
    %446 = vector.multi_reduction <add>, %439, %cst_186 [0] : vector<16x18xf32> to vector<18xf32>
    %447 = vector.shape_cast %446 : vector<18xf32> to vector<1x18xf32>
    %cst_187 = arith.constant 1.600000e+01 : f32
    %448 = vector.broadcast %cst_187 : f32 to vector<1x18xf32>
    %449 = arith.divf %447, %448 : vector<1x18xf32>
    %450 = arith.mulf %439, %439 : vector<16x18xf32>
    %cst_188 = arith.constant dense<0.000000e+00> : vector<18xf32>
    %451 = vector.multi_reduction <add>, %450, %cst_188 [0] : vector<16x18xf32> to vector<18xf32>
    %452 = vector.shape_cast %451 : vector<18xf32> to vector<1x18xf32>
    %cst_189 = arith.constant 1.600000e+01 : f32
    %453 = vector.broadcast %cst_189 : f32 to vector<1x18xf32>
    %454 = arith.divf %452, %453 : vector<1x18xf32>
    %455 = arith.mulf %449, %449 : vector<1x18xf32>
    %456 = arith.subf %454, %455 : vector<1x18xf32>
    %457 = vector.broadcast %449 : vector<1x18xf32> to vector<16x18xf32>
    %458 = arith.subf %439, %457 : vector<16x18xf32>
    %cst_190 = arith.constant 9.99999974E-6 : f32
    %459 = vector.broadcast %cst_190 : f32 to vector<1x18xf32>
    %460 = arith.addf %456, %459 : vector<1x18xf32>
    %461 = math.rsqrt %460 : vector<1x18xf32>
    %462 = vector.broadcast %461 : vector<1x18xf32> to vector<16x18xf32>
    %463 = arith.mulf %458, %462 : vector<16x18xf32>
    %464 = vector.broadcast %442 : vector<1x18xf32> to vector<16x18xf32>
    %465 = arith.mulf %464, %463 : vector<16x18xf32>
    %466 = vector.broadcast %445 : vector<1x18xf32> to vector<16x18xf32>
    %467 = arith.addf %465, %466 : vector<16x18xf32>
    %cst_191 = arith.constant 0.000000e+00 : f32
    %468 = vector.broadcast %cst_191 : f32 to vector<16x18xf32>
    %469 = arith.maximumf %467, %468 : vector<16x18xf32>
    %470 = arith.index_cast %391 : i32 to index
    %c0_192 = arith.constant 0 : index
    %c0_193 = arith.constant 0 : index
    %471 = vector.load %arg13[%470, %c0_192, %c0_193] : memref<4x18x8xf32, #tpu.memory_space<vmem>>, vector<1x18x8xf32>
    %472 = vector.shape_cast %471 : vector<1x18x8xf32> to vector<18x8xf32>
    %cst_194 = arith.constant dense<0.000000e+00> : vector<16x8xf32>
    %473 = tpu.matmul %469, %472, %cst_194 {dimension_numbers = #tpu.dot_dimension_numbers<[1], [0], [0], [1], [0, 0, 1, 1], [], []>} : vector<16x18xf32>, vector<18x8xf32>, vector<16x8xf32> -> vector<16x8xf32>
    %474 = arith.index_cast %391 : i32 to index
    %c0_195 = arith.constant 0 : index
    %c0_196 = arith.constant 0 : index
    %475 = vector.load %arg14[%474, %c0_195, %c0_196] : memref<4x1x8xf32, #tpu.memory_space<vmem>>, vector<1x1x8xf32>
    %476 = vector.shape_cast %475 : vector<1x1x8xf32> to vector<1x8xf32>
    %477 = vector.broadcast %476 : vector<1x8xf32> to vector<16x8xf32>
    %478 = arith.addf %473, %477 : vector<16x8xf32>
    %cst_197 = arith.constant -0.888888895 : f32
    %479 = vector.broadcast %cst_197 : f32 to vector<16x8xf32>
    %480 = arith.mulf %479, %478 : vector<16x8xf32>
    %cst_198 = arith.constant 1.100000e+00 : f32
    %481 = vector.broadcast %cst_198 : f32 to vector<16x8xf32>
    %482 = arith.mulf %481, %371 : vector<16x8xf32>
    %cst_199 = arith.constant 3.000000e-01 : f32
    %483 = arith.mulf %cst_199, %379 : f32
    %484 = vector.broadcast %483 : f32 to vector<16x8xf32>
    %485 = arith.subf %482, %484 : vector<16x8xf32>
    %cst_200 = arith.constant 6.000000e-01 : f32
    %486 = arith.mulf %cst_200, %383 : f32
    %487 = vector.broadcast %486 : f32 to vector<16x8xf32>
    %488 = arith.subf %485, %487 : vector<16x8xf32>
    %489 = vector.broadcast %381 : f32 to vector<16x8xf32>
    %490 = arith.subf %488, %489 : vector<16x8xf32>
    %cst_201 = arith.constant 5.000000e-01 : f32
    %491 = vector.broadcast %cst_201 : f32 to vector<16x8xf32>
    %492 = arith.mulf %491, %490 : vector<16x8xf32>
    %493 = arith.mulf %492, %490 : vector<16x8xf32>
    %cst_202 = arith.constant 4.500000e-01 : f32
    %494 = vector.broadcast %cst_202 : f32 to vector<16x8xf32>
    %495 = arith.mulf %494, %480 : vector<16x8xf32>
    %496 = arith.mulf %495, %480 : vector<16x8xf32>
    %497 = arith.addf %493, %496 : vector<16x8xf32>
    %498 = vector.broadcast %377 : f32 to vector<16x8xf32>
    %499 = arith.mulf %497, %498 : vector<16x8xf32>
    %500 = arith.subf %354, %499 : vector<16x8xf32>
    %cst_203 = arith.constant 2.500000e-01 : f32
    %501 = vector.broadcast %cst_203 : f32 to vector<1x8xf32>
    %502 = arith.mulf %501, %390 : vector<1x8xf32>
    %503 = vector.broadcast %502 : vector<1x8xf32> to vector<16x8xf32>
    %504 = arith.mulf %478, %503 : vector<16x8xf32>
    %505 = arith.addf %500, %504 : vector<16x8xf32>
    %cst_204 = arith.constant 2.500000e-01 : f32
    %506 = arith.mulf %385, %cst_204 : f32
    %507 = arith.mulf %506, %387 : f32
    %508 = vector.broadcast %507 : f32 to vector<16x8xf32>
    %509 = arith.addf %505, %508 : vector<16x8xf32>
    %cst_205 = arith.constant 5.000000e-01 : f32
    %510 = vector.broadcast %cst_205 : f32 to vector<16x8xf32>
    %511 = arith.mulf %510, %371 : vector<16x8xf32>
    %cst_206 = arith.constant 2.000000e-01 : f32
    %512 = arith.mulf %cst_206, %383 : f32
    %513 = vector.broadcast %512 : f32 to vector<16x8xf32>
    %514 = arith.addf %511, %513 : vector<16x8xf32>
    %cst_207 = arith.constant 3.000000e-01 : f32
    %515 = arith.mulf %cst_207, %379 : f32
    %516 = vector.broadcast %515 : f32 to vector<16x8xf32>
    %517 = arith.addf %514, %516 : vector<16x8xf32>
    %cst_208 = arith.constant 8.000000e-01 : f32
    %518 = vector.broadcast %cst_208 : f32 to vector<16x8xf32>
    %519 = arith.mulf %518, %480 : vector<16x8xf32>
    %520 = arith.addf %517, %519 : vector<16x8xf32>
    %521 = vector.broadcast %377 : f32 to vector<16x8xf32>
    %522 = arith.mulf %520, %521 : vector<16x8xf32>
    %cst_209 = arith.constant 2.500000e-01 : f32
    %523 = vector.broadcast %cst_209 : f32 to vector<1x8xf32>
    %524 = arith.mulf %523, %390 : vector<1x8xf32>
    %525 = vector.broadcast %524 : vector<1x8xf32> to vector<16x8xf32>
    %526 = arith.addf %522, %525 : vector<16x8xf32>
    %527 = vector.shape_cast %526 : vector<16x8xf32> to vector<1x16x8xf32>
    %c1_i32_210 = arith.constant 1 : i32
    %528 = arith.addi %c3_i32, %c1_i32_210 : i32
    %529 = arith.index_cast %528 : i32 to index
    %c0_211 = arith.constant 0 : index
    %c0_212 = arith.constant 0 : index
    %530 = vector.load %arg17[%529, %c0_211, %c0_212] : memref<6x16x8xf32, #tpu.memory_space<vmem>>, vector<1x16x8xf32>
    tpu.vector_store %arg17[%529, %c0_211, %c0_212], %527 {strides = array<i32>} : memref<6x16x8xf32, #tpu.memory_space<vmem>>, vector<1x16x8xf32>,
    %c4_i32 = arith.constant 4 : i32
    %c0_213 = arith.constant 0 : index
    %531 = arith.index_cast %c4_i32 : i32 to index
    %532 = memref.load %arg0[%c0_213, %531] : memref<6x5xf32, #tpu.memory_space<smem>>
    %c1_214 = arith.constant 1 : index
    %533 = arith.index_cast %c4_i32 : i32 to index
    %534 = memref.load %arg0[%c1_214, %533] : memref<6x5xf32, #tpu.memory_space<smem>>
    %c2_215 = arith.constant 2 : index
    %535 = arith.index_cast %c4_i32 : i32 to index
    %536 = memref.load %arg0[%c2_215, %535] : memref<6x5xf32, #tpu.memory_space<smem>>
    %c3_216 = arith.constant 3 : index
    %537 = arith.index_cast %c4_i32 : i32 to index
    %538 = memref.load %arg0[%c3_216, %537] : memref<6x5xf32, #tpu.memory_space<smem>>
    %c4_217 = arith.constant 4 : index
    %539 = arith.index_cast %c4_i32 : i32 to index
    %540 = memref.load %arg0[%c4_217, %539] : memref<6x5xf32, #tpu.memory_space<smem>>
    %c5_218 = arith.constant 5 : index
    %541 = arith.index_cast %c4_i32 : i32 to index
    %542 = memref.load %arg0[%c5_218, %541] : memref<6x5xf32, #tpu.memory_space<smem>>
    %543 = arith.index_cast %c4_i32 : i32 to index
    %c0_219 = arith.constant 0 : index
    %c0_220 = arith.constant 0 : index
    %544 = vector.load %arg2[%543, %c0_219, %c0_220] : memref<5x1x8xf32, #tpu.memory_space<vmem>>, vector<1x1x8xf32>
    %545 = vector.shape_cast %544 : vector<1x1x8xf32> to vector<1x8xf32>
    %c1_i32_221 = arith.constant 1 : i32
    %546 = arith.subi %c4_i32, %c1_i32_221 : i32
    %547 = arith.index_cast %546 : i32 to index
    %c0_222 = arith.constant 0 : index
    %c0_223 = arith.constant 0 : index
    %548 = vector.load %arg5[%547, %c0_222, %c0_223] : memref<4x8x18xf32, #tpu.memory_space<vmem>>, vector<1x8x18xf32>
    %549 = vector.shape_cast %548 : vector<1x8x18xf32> to vector<8x18xf32>
    %cst_224 = arith.constant dense<0.000000e+00> : vector<16x18xf32>
    %550 = tpu.matmul %526, %549, %cst_224 {dimension_numbers = #tpu.dot_dimension_numbers<[1], [0], [0], [1], [0, 0, 1, 1], [], []>} : vector<16x8xf32>, vector<8x18xf32>, vector<16x18xf32> -> vector<16x18xf32>
    %551 = arith.index_cast %546 : i32 to index
    %c0_225 = arith.constant 0 : index
    %c0_226 = arith.constant 0 : index
    %552 = vector.load %arg6[%551, %c0_225, %c0_226] : memref<4x1x18xf32, #tpu.memory_space<vmem>>, vector<1x1x18xf32>
    %553 = vector.shape_cast %552 : vector<1x1x18xf32> to vector<1x18xf32>
    %554 = vector.broadcast %553 : vector<1x18xf32> to vector<16x18xf32>
    %555 = arith.addf %550, %554 : vector<16x18xf32>
    %556 = arith.index_cast %546 : i32 to index
    %c0_227 = arith.constant 0 : index
    %c0_228 = arith.constant 0 : index
    %557 = vector.load %arg7[%556, %c0_227, %c0_228] : memref<4x1x18xf32, #tpu.memory_space<vmem>>, vector<1x1x18xf32>
    %558 = vector.shape_cast %557 : vector<1x1x18xf32> to vector<1x18xf32>
    %559 = arith.index_cast %546 : i32 to index
    %c0_229 = arith.constant 0 : index
    %c0_230 = arith.constant 0 : index
    %560 = vector.load %arg8[%559, %c0_229, %c0_230] : memref<4x1x18xf32, #tpu.memory_space<vmem>>, vector<1x1x18xf32>
    %561 = vector.shape_cast %560 : vector<1x1x18xf32> to vector<1x18xf32>
    %cst_231 = arith.constant dense<0.000000e+00> : vector<18xf32>
    %562 = vector.multi_reduction <add>, %555, %cst_231 [0] : vector<16x18xf32> to vector<18xf32>
    %563 = vector.shape_cast %562 : vector<18xf32> to vector<1x18xf32>
    %cst_232 = arith.constant 1.600000e+01 : f32
    %564 = vector.broadcast %cst_232 : f32 to vector<1x18xf32>
    %565 = arith.divf %563, %564 : vector<1x18xf32>
    %566 = arith.mulf %555, %555 : vector<16x18xf32>
    %cst_233 = arith.constant dense<0.000000e+00> : vector<18xf32>
    %567 = vector.multi_reduction <add>, %566, %cst_233 [0] : vector<16x18xf32> to vector<18xf32>
    %568 = vector.shape_cast %567 : vector<18xf32> to vector<1x18xf32>
    %cst_234 = arith.constant 1.600000e+01 : f32
    %569 = vector.broadcast %cst_234 : f32 to vector<1x18xf32>
    %570 = arith.divf %568, %569 : vector<1x18xf32>
    %571 = arith.mulf %565, %565 : vector<1x18xf32>
    %572 = arith.subf %570, %571 : vector<1x18xf32>
    %573 = vector.broadcast %565 : vector<1x18xf32> to vector<16x18xf32>
    %574 = arith.subf %555, %573 : vector<16x18xf32>
    %cst_235 = arith.constant 9.99999974E-6 : f32
    %575 = vector.broadcast %cst_235 : f32 to vector<1x18xf32>
    %576 = arith.addf %572, %575 : vector<1x18xf32>
    %577 = math.rsqrt %576 : vector<1x18xf32>
    %578 = vector.broadcast %577 : vector<1x18xf32> to vector<16x18xf32>
    %579 = arith.mulf %574, %578 : vector<16x18xf32>
    %580 = vector.broadcast %558 : vector<1x18xf32> to vector<16x18xf32>
    %581 = arith.mulf %580, %579 : vector<16x18xf32>
    %582 = vector.broadcast %561 : vector<1x18xf32> to vector<16x18xf32>
    %583 = arith.addf %581, %582 : vector<16x18xf32>
    %cst_236 = arith.constant 0.000000e+00 : f32
    %584 = vector.broadcast %cst_236 : f32 to vector<16x18xf32>
    %585 = arith.maximumf %583, %584 : vector<16x18xf32>
    %586 = arith.index_cast %546 : i32 to index
    %c0_237 = arith.constant 0 : index
    %c0_238 = arith.constant 0 : index
    %587 = vector.load %arg9[%586, %c0_237, %c0_238] : memref<4x18x18xf32, #tpu.memory_space<vmem>>, vector<1x18x18xf32>
    %588 = vector.shape_cast %587 : vector<1x18x18xf32> to vector<18x18xf32>
    %cst_239 = arith.constant dense<0.000000e+00> : vector<16x18xf32>
    %589 = tpu.matmul %585, %588, %cst_239 {dimension_numbers = #tpu.dot_dimension_numbers<[1], [0], [0], [1], [0, 0, 1, 1], [], []>} : vector<16x18xf32>, vector<18x18xf32>, vector<16x18xf32> -> vector<16x18xf32>
    %590 = arith.index_cast %546 : i32 to index
    %c0_240 = arith.constant 0 : index
    %c0_241 = arith.constant 0 : index
    %591 = vector.load %arg10[%590, %c0_240, %c0_241] : memref<4x1x18xf32, #tpu.memory_space<vmem>>, vector<1x1x18xf32>
    %592 = vector.shape_cast %591 : vector<1x1x18xf32> to vector<1x18xf32>
    %593 = vector.broadcast %592 : vector<1x18xf32> to vector<16x18xf32>
    %594 = arith.addf %589, %593 : vector<16x18xf32>
    %595 = arith.index_cast %546 : i32 to index
    %c0_242 = arith.constant 0 : index
    %c0_243 = arith.constant 0 : index
    %596 = vector.load %arg11[%595, %c0_242, %c0_243] : memref<4x1x18xf32, #tpu.memory_space<vmem>>, vector<1x1x18xf32>
    %597 = vector.shape_cast %596 : vector<1x1x18xf32> to vector<1x18xf32>
    %598 = arith.index_cast %546 : i32 to index
    %c0_244 = arith.constant 0 : index
    %c0_245 = arith.constant 0 : index
    %599 = vector.load %arg12[%598, %c0_244, %c0_245] : memref<4x1x18xf32, #tpu.memory_space<vmem>>, vector<1x1x18xf32>
    %600 = vector.shape_cast %599 : vector<1x1x18xf32> to vector<1x18xf32>
    %cst_246 = arith.constant dense<0.000000e+00> : vector<18xf32>
    %601 = vector.multi_reduction <add>, %594, %cst_246 [0] : vector<16x18xf32> to vector<18xf32>
    %602 = vector.shape_cast %601 : vector<18xf32> to vector<1x18xf32>
    %cst_247 = arith.constant 1.600000e+01 : f32
    %603 = vector.broadcast %cst_247 : f32 to vector<1x18xf32>
    %604 = arith.divf %602, %603 : vector<1x18xf32>
    %605 = arith.mulf %594, %594 : vector<16x18xf32>
    %cst_248 = arith.constant dense<0.000000e+00> : vector<18xf32>
    %606 = vector.multi_reduction <add>, %605, %cst_248 [0] : vector<16x18xf32> to vector<18xf32>
    %607 = vector.shape_cast %606 : vector<18xf32> to vector<1x18xf32>
    %cst_249 = arith.constant 1.600000e+01 : f32
    %608 = vector.broadcast %cst_249 : f32 to vector<1x18xf32>
    %609 = arith.divf %607, %608 : vector<1x18xf32>
    %610 = arith.mulf %604, %604 : vector<1x18xf32>
    %611 = arith.subf %609, %610 : vector<1x18xf32>
    %612 = vector.broadcast %604 : vector<1x18xf32> to vector<16x18xf32>
    %613 = arith.subf %594, %612 : vector<16x18xf32>
    %cst_250 = arith.constant 9.99999974E-6 : f32
    %614 = vector.broadcast %cst_250 : f32 to vector<1x18xf32>
    %615 = arith.addf %611, %614 : vector<1x18xf32>
    %616 = math.rsqrt %615 : vector<1x18xf32>
    %617 = vector.broadcast %616 : vector<1x18xf32> to vector<16x18xf32>
    %618 = arith.mulf %613, %617 : vector<16x18xf32>
    %619 = vector.broadcast %597 : vector<1x18xf32> to vector<16x18xf32>
    %620 = arith.mulf %619, %618 : vector<16x18xf32>
    %621 = vector.broadcast %600 : vector<1x18xf32> to vector<16x18xf32>
    %622 = arith.addf %620, %621 : vector<16x18xf32>
    %cst_251 = arith.constant 0.000000e+00 : f32
    %623 = vector.broadcast %cst_251 : f32 to vector<16x18xf32>
    %624 = arith.maximumf %622, %623 : vector<16x18xf32>
    %625 = arith.index_cast %546 : i32 to index
    %c0_252 = arith.constant 0 : index
    %c0_253 = arith.constant 0 : index
    %626 = vector.load %arg13[%625, %c0_252, %c0_253] : memref<4x18x8xf32, #tpu.memory_space<vmem>>, vector<1x18x8xf32>
    %627 = vector.shape_cast %626 : vector<1x18x8xf32> to vector<18x8xf32>
    %cst_254 = arith.constant dense<0.000000e+00> : vector<16x8xf32>
    %628 = tpu.matmul %624, %627, %cst_254 {dimension_numbers = #tpu.dot_dimension_numbers<[1], [0], [0], [1], [0, 0, 1, 1], [], []>} : vector<16x18xf32>, vector<18x8xf32>, vector<16x8xf32> -> vector<16x8xf32>
    %629 = arith.index_cast %546 : i32 to index
    %c0_255 = arith.constant 0 : index
    %c0_256 = arith.constant 0 : index
    %630 = vector.load %arg14[%629, %c0_255, %c0_256] : memref<4x1x8xf32, #tpu.memory_space<vmem>>, vector<1x1x8xf32>
    %631 = vector.shape_cast %630 : vector<1x1x8xf32> to vector<1x8xf32>
    %632 = vector.broadcast %631 : vector<1x8xf32> to vector<16x8xf32>
    %633 = arith.addf %628, %632 : vector<16x8xf32>
    %cst_257 = arith.constant -0.888888895 : f32
    %634 = vector.broadcast %cst_257 : f32 to vector<16x8xf32>
    %635 = arith.mulf %634, %633 : vector<16x8xf32>
    %cst_258 = arith.constant 1.100000e+00 : f32
    %636 = vector.broadcast %cst_258 : f32 to vector<16x8xf32>
    %637 = arith.mulf %636, %526 : vector<16x8xf32>
    %cst_259 = arith.constant 3.000000e-01 : f32
    %638 = arith.mulf %cst_259, %534 : f32
    %639 = vector.broadcast %638 : f32 to vector<16x8xf32>
    %640 = arith.subf %637, %639 : vector<16x8xf32>
    %cst_260 = arith.constant 6.000000e-01 : f32
    %641 = arith.mulf %cst_260, %538 : f32
    %642 = vector.broadcast %641 : f32 to vector<16x8xf32>
    %643 = arith.subf %640, %642 : vector<16x8xf32>
    %644 = vector.broadcast %536 : f32 to vector<16x8xf32>
    %645 = arith.subf %643, %644 : vector<16x8xf32>
    %cst_261 = arith.constant 5.000000e-01 : f32
    %646 = vector.broadcast %cst_261 : f32 to vector<16x8xf32>
    %647 = arith.mulf %646, %645 : vector<16x8xf32>
    %648 = arith.mulf %647, %645 : vector<16x8xf32>
    %cst_262 = arith.constant 4.500000e-01 : f32
    %649 = vector.broadcast %cst_262 : f32 to vector<16x8xf32>
    %650 = arith.mulf %649, %635 : vector<16x8xf32>
    %651 = arith.mulf %650, %635 : vector<16x8xf32>
    %652 = arith.addf %648, %651 : vector<16x8xf32>
    %653 = vector.broadcast %532 : f32 to vector<16x8xf32>
    %654 = arith.mulf %652, %653 : vector<16x8xf32>
    %655 = arith.subf %509, %654 : vector<16x8xf32>
    %cst_263 = arith.constant 2.500000e-01 : f32
    %656 = vector.broadcast %cst_263 : f32 to vector<1x8xf32>
    %657 = arith.mulf %656, %545 : vector<1x8xf32>
    %658 = vector.broadcast %657 : vector<1x8xf32> to vector<16x8xf32>
    %659 = arith.mulf %633, %658 : vector<16x8xf32>
    %660 = arith.addf %655, %659 : vector<16x8xf32>
    %cst_264 = arith.constant 2.500000e-01 : f32
    %661 = arith.mulf %540, %cst_264 : f32
    %662 = arith.mulf %661, %542 : f32
    %663 = vector.broadcast %662 : f32 to vector<16x8xf32>
    %664 = arith.addf %660, %663 : vector<16x8xf32>
    %cst_265 = arith.constant 5.000000e-01 : f32
    %665 = vector.broadcast %cst_265 : f32 to vector<16x8xf32>
    %666 = arith.mulf %665, %526 : vector<16x8xf32>
    %cst_266 = arith.constant 2.000000e-01 : f32
    %667 = arith.mulf %cst_266, %538 : f32
    %668 = vector.broadcast %667 : f32 to vector<16x8xf32>
    %669 = arith.addf %666, %668 : vector<16x8xf32>
    %cst_267 = arith.constant 3.000000e-01 : f32
    %670 = arith.mulf %cst_267, %534 : f32
    %671 = vector.broadcast %670 : f32 to vector<16x8xf32>
    %672 = arith.addf %669, %671 : vector<16x8xf32>
    %cst_268 = arith.constant 8.000000e-01 : f32
    %673 = vector.broadcast %cst_268 : f32 to vector<16x8xf32>
    %674 = arith.mulf %673, %635 : vector<16x8xf32>
    %675 = arith.addf %672, %674 : vector<16x8xf32>
    %676 = vector.broadcast %532 : f32 to vector<16x8xf32>
    %677 = arith.mulf %675, %676 : vector<16x8xf32>
    %cst_269 = arith.constant 2.500000e-01 : f32
    %678 = vector.broadcast %cst_269 : f32 to vector<1x8xf32>
    %679 = arith.mulf %678, %545 : vector<1x8xf32>
    %680 = vector.broadcast %679 : vector<1x8xf32> to vector<16x8xf32>
    %681 = arith.addf %677, %680 : vector<16x8xf32>
    %682 = vector.shape_cast %681 : vector<16x8xf32> to vector<1x16x8xf32>
    %c1_i32_270 = arith.constant 1 : i32
    %683 = arith.addi %c4_i32, %c1_i32_270 : i32
    %684 = arith.index_cast %683 : i32 to index
    %c0_271 = arith.constant 0 : index
    %c0_272 = arith.constant 0 : index
    %685 = vector.load %arg17[%684, %c0_271, %c0_272] : memref<6x16x8xf32, #tpu.memory_space<vmem>>, vector<1x16x8xf32>
    tpu.vector_store %arg17[%684, %c0_271, %c0_272], %682 {strides = array<i32>} : memref<6x16x8xf32, #tpu.memory_space<vmem>>, vector<1x16x8xf32>,
    %c4_i32_273 = arith.constant 4 : i32
    %c0_274 = arith.constant 0 : index
    %c0_275 = arith.constant 0 : index
    %686 = vector.load %arg15[%c0_274, %c0_275] : memref<16x8xf32, #tpu.memory_space<vmem>>, vector<16x8xf32>
    tpu.vector_store %arg15[%c0_274, %c0_275], %664 {strides = array<i32>} : memref<16x8xf32, #tpu.memory_space<vmem>>, vector<16x8xf32>,
    %c0_276 = arith.constant 0 : index
    %c0_277 = arith.constant 0 : index
    %687 = vector.load %arg16[%c0_276, %c0_277] : memref<16x8xf32, #tpu.memory_space<vmem>>, vector<16x8xf32>
    tpu.vector_store %arg16[%c0_276, %c0_277], %681 {strides = array<i32>} : memref<16x8xf32, #tpu.memory_space<vmem>>, vector<16x8xf32>,
    return
  }
}

</mosaic_0001>

<bundles_post_ra>
// kernel: tpu_custom_call.1
= control target key start
LH: loop header
LB: loop body
LE: loop exit
PB: predicated region body
PF: predicated region fallthrough
CT: control target
= control target key end

     0   :  { %s2975_s0 = inlined_call_operand.vmem [shape: f32[6,5], index: 0, kind: input, shape index: {}]   ;;  %s2976_s1 = inlined_call_operand.vmem [shape: f32[16,8], index: 1, kind: input, shape index: {}]   ;;  %s2977_s2 = inlined_call_operand.vmem [shape: f32[5,1,8], index: 2, kind: input, shape index: {}]   ;;  %s2978_s3 = inlined_call_operand.vmem [shape: f32[1,8], index: 3, kind: input, shape index: {}]   ;;  %s2979_s4 = inlined_call_operand.vmem [shape: f32[1,8], index: 4, kind: input, shape index: {}]   ;;  %s2980_s5 = inlined_call_operand.vmem [shape: f32[4,8,18], index: 5, kind: input, shape index: {}]   ;;  %s2981_s6 = inlined_call_operand.vmem [shape: f32[4,1,18], index: 6, kind: input, shape index: {}]   ;;  %s2982_s7 = inlined_call_operand.vmem [shape: f32[4,1,18], index: 7, kind: input, shape index: {}]   ;;  %s2983_s8 = inlined_call_operand.vmem [shape: f32[4,1,18], index: 8, kind: input, shape index: {}]   ;;  %s2984_s9 = inlined_call_operand.vmem [shape: f32[4,18,18], index: 9, kind: input, shape index: {}]   ;;  %s2985_s10 = inlined_call_operand.vmem [shape: f32[4,1,18], index: 10, kind: input, shape index: {}]   ;;  %s2986_s11 = inlined_call_operand.vmem [shape: f32[4,1,18], index: 11, kind: input, shape index: {}]   ;;  %s2987_s12 = inlined_call_operand.vmem [shape: f32[4,1,18], index: 12, kind: input, shape index: {}]   ;;  %s2988_s13 = inlined_call_operand.vmem [shape: f32[4,18,8], index: 13, kind: input, shape index: {}]   ;;  %s2989_s14 = inlined_call_operand.vmem [shape: f32[4,1,8], index: 14, kind: input, shape index: {}]   ;;  %s2990_s15 = inlined_call_operand.vmem [shape: f32[16,8], index: 15, kind: output, shape index: {0}]   ;;  %s2991_s16 = inlined_call_operand.vmem [shape: f32[16,8], index: 16, kind: output, shape index: {1}]   ;;  %s2992_s17 = inlined_call_operand.vmem [shape: f32[6,16,8], index: 17, kind: output, shape index: {2}]  }
   0x1   :  { %2994 = sst [smem:[#allocation5_spill]] %s2975_s0 }
   0x2   :  { %2995 = sst [smem:[#allocation6_spill]] %s2976_s1 }
   0x3   :  { %23 = vsyncpa [#allocation3], 0  ;;  %s2996_s26 = sld [smem:[#allocation5_spill]] }
   0x9   :  { %s30_s27 = sshll.u32 %s2996_s26, 4  ;;  %s31_s27 = int_to_ptr.vmem [resolvable:$true] %s30_s27 }
   0xa   :  { %s2353_s28 = scalar_lea.vmem %s31_s27, 128  ;;  %p2358_p1 = scmp.lt.s32.totalorder %s31_s27, %s31_s27 }
   0xb   :  { %p2354_p0 = scmp.ne.s32.totalorder %s31_s27, %s2353_s28  ;;  %p2359_p2 = scmp.lt.s32.totalorder %s2353_s28, %s2353_s28 }
   0xd   :  { %p2360_p3 = por %p2359_p2, %p2358_p1 }
   0xf   :  { %p2361_p4 = pnand %p2360_p3, %p2354_p0 }
  0x11   :  { %2364 = shalt.err (!%p2361_p4)
}
  0x12   :  { %s2367_s29 = smov [#allocation2]  }
  0x13   :  { %33 = dma.vmem_to_smem %s31_s27, 128, %s2367_s29, [#allocation3]  }
  0x14   :  { %2365 = dma.done.wait [#allocation3], 128  }
  0x15   :  { %2366 = vsyncadd [#allocation3], 4294967168 }
  0x16   :  { %65 = sfence }
  0x17   :  { %v172_v0 = vld [vmem:[%s2980_s5] sm:$0xff]  ;;  %s2997_s1 = sld [smem:[#allocation6_spill]]  ;;  %vm68_vm0 = vcmask 64512   ;;  %v101_v2 = vlaneseq  ;;  %s2014_s24 = sld [smem:[#allocation2 + $0x80]]  ;;  %v314_v34 = vld [vmem:[%s2984_s9 + $0x8] sm:$0xff]  ;;  %vm329_vm1 = vcmask 1041408  }
  0x18   :  { %2212 = vmatprep.subr.mxu0 %v172_v0  ;;  %s2474_s25 = sld [smem:[#allocation2 + $0x180]]  ;;  %v77_v4 = vld [vmem:[%s2977_s2] sm:$0x1]  ;;  %v315_v36 = vld [vmem:[%s2984_s9 + $0x10] sm:$0x3]  ;;  %vm263_vm2 = vcmask 146432  }
  0x19   :  { %2213 = vmatpush3.msra.mxu0 %v172_v0  ;;  %v78_v5 = vld [vmem:[%s2979_s4] sm:$0x1]  ;;  %v119_v6 = vmul.f32 0.25, %v77_v4  ;;  %v102_v8 = vshrl.u32 %v101_v2, 7  ;;  %s71_s18 = sld [smem:[#allocation2]]  ;;  %s2023_s4 = sld [smem:[#allocation2 + $0x81]] }
  0x1a   :  { %v2486_v7 = vmul.f32 -0.8888889, %v78_v5  ;;  %v313_v33 = vld [vmem:[%s2984_s9] sm:$0xff]  ;;  %s2567_s27 = sld [smem:[#allocation2 + $0x100]]  ;;  %s2614_s20 = sld [smem:[#allocation2 + $0x181]] }
  0x1b   :  { %v2488_v9 = vmul.f32 %v119_v6, %v78_v5  ;;  %v2494_v13 = vsub.s32 0, %v102_v8  ;;  %v2304_v35 = vpack.c.bf16 %v314_v34, %v313_v33  ;;  %v2029_v37 = vld [vmem:[%s2981_s6] ss:$0 sm:$0xff]  ;;  %s2024_s26 = sld [smem:[#allocation2 + $0x101]]  ;;  %s2018_s0 = sld [smem:[#allocation2 + $0x280]] }
  0x1c   :  { %v142_v14 = vmul.f32 0.8, %v2486_v7  ;;  %s2084_s23 = sld [smem:[#allocation2 + $0x3]] }
  0x1d   :  { %v66_v1 = vld [vmem:[%s2997_s1] sm:$0xff]  ;;  %v67_v3 = vld [vmem:[%s2997_s1 + $0x8] sm:$0xff]  ;;  %s83_s19 = smul.f32 0.3, %s2014_s24  ;;  %v157_v27 = vrot.slane %v119_v6, %v2494_v13  ;;  %2305 = vmatprep.subr.bf16.mxu1 %v2304_v35 }
  0x1e   :  { %69 = vst.msk [vmem:[%s2992_s17] sm:$0xff] %vm68_vm0, %v66_v1  ;;  %70 = vst.msk [vmem:[%s2992_s17 + $0x8] sm:$0xff] %vm68_vm0, %v67_v3  ;;  %v2490_v10 = vmul.f32 1.1, %v66_v1  ;;  %v134_v11 = vmul.f32 0.5, %v66_v1  ;;  %v135_v15 = vmul.f32 0.5, %v67_v3  ;;  %v147_v21 = vrot.slane %v142_v14, %v2494_v13  ;;  %2307 = vmatpush3.bf16.msra.mxu1 %v2304_v35 }
  0x1f   :  { %v2492_v12 = vmul.f32 1.1, %v67_v3  ;;  %s136_s1 = smul.f32 0.2, %s2474_s25  ;;  %v2498_v16 = vstv %s83_s19  ;;  %v2507_v25 = vstv %s71_s18  ;;  %2221 = vmatprep.subr.msk.mxu1 %vm329_vm1, %v315_v36  ;;  %v2032_v6 = vld [vmem:[%s2982_s7] ss:$0 sm:$0xff] }
  0x20   :  { %v85_v17 = vsub.f32 %v2490_v10, %v2498_v16  ;;  %v2033_v14 = vld [vmem:[%s2983_s8] ss:$0 sm:$0xff]  ;;  %s87_s28 = smul.f32 0.6, %s2474_s25  ;;  %v91_v35 = vstv %s2567_s27  ;;  %s2017_s27 = sld [smem:[#allocation2 + $0x200]] }
  0x21   :  { %v137_v18 = vstv %s136_s1  ;;  %v86_v19 = vsub.f32 %v2492_v12, %v2498_v16  ;;  %s556_s21 = smul.f32 0.3, %s2023_s4  ;;  %s2642_s1 = sld [smem:[#allocation2 + $0x82]] }
  0x22   :  { %v138_v20 = vadd.f32 %v137_v18, %v134_v11  ;;  %v139_v22 = vadd.f32 %v137_v18, %v135_v15  ;;  %2222 = vmatpush3.msk.msra.mxu1 %vm329_vm1, %v315_v36  ;;  %s560_s22 = smul.f32 0.6, %s2614_s20 }
  0x23   :  { %s600_s29 = smul.f32 0.2, %s2614_s20  ;;  %s2644_s20 = sld [smem:[#allocation2 + $0x182]] }
  0x24   :  { %v140_v23 = vadd.f32 %v138_v20, %v2498_v16  ;;  %v141_v24 = vadd.f32 %v139_v22, %v2498_v16  ;;  %v2053_v16 = vld [vmem:[%s2980_s5 + $0x8] sm:$0xff] }
  0x25   :  { %2235 = vmatprep.subr.mxu1 %v2053_v16 }
  0x26   :  { %v149_v26 = vadd.f32 %v147_v21, %v140_v23  ;;  %v150_v28 = vadd.f32 %v147_v21, %v141_v24  ;;  %v458_v24 = vld [vmem:[%s2988_s13] sm:$0xff]  ;;  %s129_s30 = smul.f32 0.25, %s2017_s27  ;;  %s2027_s27 = sld [smem:[#allocation2 + $0x281]] }
  0x28   :  { %v151_v29 = vmul.f32 %v149_v26, %v2507_v25  ;;  %v152_v30 = vmul.f32 %v150_v28, %v2507_v25  ;;  %v459_v26 = vld [vmem:[%s2988_s13 + $0x8] sm:$0xff]  ;;  %v460_v28 = vld [vmem:[%s2988_s13 + $0x10] sm:$0x3]  ;;  %s130_s4 = smul.f32 %s2018_s0, %s129_s30 }
  0x2a   :  { %v2512_v31 = vadd.f32 %v157_v27, %v151_v29  ;;  %v2514_v32 = vadd.f32 %v157_v27, %v152_v30  ;;  %v2308_v27 = vpack.c.bf16 %v459_v26, %v458_v24  ;;  %v98_v29 = vmul.f32 0.45, %v2486_v7 }
  0x2b   :  { %v2571_v30 = vstv %s87_s28  ;;  %s2046_s28 = sld [smem:[#allocation2 + $0x2]] }
  0x2c   :  { %2020 = vst.msk [vmem:[%s2992_s17 + $0x10] sm:$0xff] %vm68_vm0, %v2512_v31  ;;  %2214 = vmatprep.mubr.msk.f32.mxu0 %vm68_vm0, %v2512_v31  ;;  %2021 = vst.msk [vmem:[%s2992_s17 + $0x18] sm:$0xff] %vm68_vm0, %v2514_v32  ;;  %2309 = vmatprep.subr.bf16.mxu0 %v2308_v27  ;;  %v90_v33 = vsub.f32 %v86_v19, %v2571_v30  ;;  %v99_v34 = vmul.f32 %v98_v29, %v2486_v7 }
  0x2d   :  { %2215 = vmatmul.mubr.msk.f32.vlgmr.msra.gmra.mrb[0].mxu0 %vm68_vm0, %v2514_v32  ;;  %v2593_v7 = vrot.slane %v2488_v9, %v2494_v13 }
  0x2e   :  { %2311 = vmatpush3.bf16.msra.mxu0 %v2308_v27  ;;  %v93_v36 = vsub.f32 %v90_v33, %v91_v35  ;;  %v555_v33 = vmul.f32 1.1, %v2514_v32 }
  0x2f   :  { %2230 = vmatprep.subr.msk.mxu0 %vm329_vm1, %v460_v28 }
  0x32   :  { %2231 = vmatpush3.msk.msra.mxu0 %vm329_vm1, %v460_v28 }
 0x100   :  { %v2216_v38 = vpop.f32.mrb[0].mxu0 }
 0x101   :  { %v258_v39 = vadd.f32 %v2216_v38, %v2029_v37  ;;  %v252_v40 = vpop.f32.mrb[1].mxu0  ;;  %v2582_v38 = vrot.slane %v99_v34, %v2494_v13  ;;  %v554_v34 = vmul.f32 1.1, %v2512_v31 }
 0x102   :  { %v253_v41 = vadd.f32 %v2029_v37, %v252_v40  ;;  %v95_v37 = vmul.f32 0.5, %v93_v36 }
 0x103   :  { %v265_v42 = vsel %vm263_vm2, %v258_v39, 0.0  ;;  %v276_v43 = vmul.f32 %v258_v39, %v258_v39 }
 0x104   :  { %v264_v44 = vsel %vm263_vm2, %v253_v41, 0.0  ;;  %v275_v45 = vmul.f32 %v253_v41, %v253_v41 }
 0x105   :  { %v278_v46 = vsel %vm263_vm2, %v276_v43, 0.0  ;;  %v266_v47 = vadd.f32 %v265_v42, %v264_v44  ;;  %v2034_v43 = vld [vmem:[%s2985_s10] ss:$0 sm:$0xff] }
 0x106   :  { %v277_v48 = vsel %vm263_vm2, %v275_v45, 0.0 }
 0x107   :  { %v267_v49 = vrot.slane %v266_v47, 4  ;;  %v279_v50 = vadd.f32 %v278_v46, %v277_v48 }
 0x109   :  { %v268_v51 = vadd.f32 %v267_v49, %v266_v47  ;;  %v280_v52 = vrot.slane %v279_v50, 4 }
 0x10b   :  { %v269_v53 = vrot.slane %v268_v51, 2  ;;  %v281_v54 = vadd.f32 %v280_v52, %v279_v50 }
 0x10d   :  { %v270_v55 = vadd.f32 %v269_v53, %v268_v51  ;;  %v282_v56 = vrot.slane %v281_v54, 2 }
 0x10f   :  { %v271_v57 = vrot.slane %v270_v55, 1  ;;  %v283_v58 = vadd.f32 %v282_v56, %v281_v54 }
 0x111   :  { %v272_v59 = vadd.f32 %v271_v57, %v270_v55  ;;  %v284_v60 = vrot.slane %v283_v58, 1 }
 0x113   :  { %v274_v61 = vmul.f32 0.0625, %v272_v59  ;;  %v285_v62 = vadd.f32 %v284_v60, %v283_v58 }
 0x115   :  { %v286_v63 = vmul.f32 0.0625, %v285_v62  ;;  %v287_v0 = vmul.f32 %v274_v61, %v274_v61  ;;  %v289_v1 = vsub.f32 %v253_v41, %v274_v61  ;;  %v290_v2 = vsub.f32 %v258_v39, %v274_v61  ;;  %v2588_v41 = vld [vmem:[%s2978_s3] ss:$0 sm:$0xff]  ;;  %s2022_s3 = sld [smem:[#allocation2 + $0x1]] }
 0x116   :  { %v97_v39 = vmul.f32 %v95_v37, %v93_v36  ;;  %v89_v36 = vsub.f32 %v85_v17, %v2571_v30  ;;  %v557_v37 = vstv %s556_s21  ;;  %v2028_v17 = vld [vmem:[%s2977_s2 + $0x1] sm:$0x1]  ;;  %v564_v30 = vstv %s2024_s26  ;;  %s1016_s21 = smul.f32 0.3, %s2642_s1  ;;  %s2089_s1 = sld [smem:[#allocation2 + $0x283]] }
 0x117   :  { %v288_v3 = vsub.f32 %v286_v63, %v287_v0  ;;  %s1060_s26 = smul.f32 0.2, %s2644_s20 }
 0x118   :  { %v107_v40 = vadd.f32 %v2582_v38, %v97_v39  ;;  %v92_v39 = vsub.f32 %v89_v36, %v91_v35  ;;  %v599_v35 = vmul.f32 0.5, %v2514_v32 }
 0x119   :  { %v291_v4 = vadd.f32 1e-05, %v288_v3 }
 0x11a   :  { %v110_v12 = vmul.f32 %v2507_v25, %v107_v40  ;;  %v559_v40 = vsub.f32 %v555_v33, %v557_v37 }
 0x11b   :  { %2337 = vrsqrt.f32 %v291_v4 }
 0x11c   :  { %v118_v19 = vsub.f32 %v2588_v41, %v110_v12  ;;  %v561_v12 = vstv %s560_s22  ;;  %s1020_s22 = smul.f32 0.6, %s2644_s20  ;;  %s2748_s20 = sld [smem:[#allocation2 + $0x83]] }
 0x11e   :  { %v2597_v42 = vadd.f32 %v2593_v7, %v118_v19  ;;  %v94_v19 = vmul.f32 0.5, %v92_v39 }
 0x122   :  { %s1476_s18 = smul.f32 0.3, %s2748_s20  ;;  %s2125_s20 = sld [smem:[#allocation2 + $0x184]] }
 0x125   :  { %v2338_v5 = vpop.eup %2337 }
 0x126   :  { %v293_v8 = vmul.f32 %v2338_v5, %v289_v1  ;;  %v294_v11 = vmul.f32 %v2338_v5, %v290_v2 }
 0x128   :  { %v301_v15 = vmul.f32 %v2032_v6, %v293_v8  ;;  %v302_v18 = vmul.f32 %v2032_v6, %v294_v11 }
 0x12a   :  { %v309_v20 = vadd.f32 %v2033_v14, %v301_v15  ;;  %v310_v21 = vadd.f32 %v2033_v14, %v302_v18  ;;  %v2038_v18 = vld [vmem:[%s2986_s11] ss:$0 sm:$0xff] }
 0x12c   :  { %v311_v22 = vmax.f32 %v309_v20, 0.0  ;;  %v312_v23 = vmax.f32 %v310_v21, 0.0 }
 0x12e   :  { %2223 = vmatprep.mubr.msk.f32.mxu1 %vm263_vm2, %v311_v22  ;;  %v2039_v22 = vld [vmem:[%s2987_s12] ss:$0 sm:$0xff] }
 0x12f   :  { %2224 = vmatmul.mubr.msk.f32.vlgmr.msra.gmra.mrb[0].mxu1 %vm263_vm2, %v312_v23 }
 0x130   :  { %2236 = vmatpush3.msra.mxu1 %v2053_v16  ;;  %v2055_v16 = vld [vmem:[%s2981_s6 + $0x1] ss:$0 sm:$0xff] }
 0x202   :  { %v2225_v44 = vpop.f32.mrb[0].mxu1 }
 0x203   :  { %v405_v45 = vadd.f32 %v2225_v44, %v2034_v43  ;;  %v399_v46 = vpop.f32.mrb[1].mxu1  ;;  %v563_v44 = vsub.f32 %v559_v40, %v561_v12  ;;  %v1021_v40 = vstv %s1020_s22  ;;  %s2026_s22 = sld [smem:[#allocation2 + $0x201]] }
 0x204   :  { %v400_v47 = vadd.f32 %v2034_v43, %v399_v46  ;;  %v558_v43 = vsub.f32 %v554_v34, %v557_v37  ;;  %v2653_v34 = vstv %s1016_s21  ;;  %s2048_s21 = sld [smem:[#allocation2 + $0x102]] }
 0x205   :  { %v411_v48 = vsel %vm263_vm2, %v405_v45, 0.0  ;;  %v421_v49 = vmul.f32 %v405_v45, %v405_v45 }
 0x206   :  { %v410_v50 = vsel %vm263_vm2, %v400_v47, 0.0  ;;  %v420_v9 = vmul.f32 %v400_v47, %v400_v47  ;;  %v562_v46 = vsub.f32 %v558_v43, %v561_v12 }
 0x207   :  { %v423_v51 = vsel %vm263_vm2, %v421_v49, 0.0  ;;  %v412_v52 = vadd.f32 %v411_v48, %v410_v50  ;;  %v2040_v50 = vld [vmem:[%s2989_s14] ss:$0 sm:$0xff] }
 0x208   :  { %v422_v53 = vsel %vm263_vm2, %v420_v9, 0.0  ;;  %v565_v9 = vsub.f32 %v562_v46, %v564_v30 }
 0x209   :  { %v413_v54 = vrot.slane %v412_v52, 4  ;;  %v424_v55 = vadd.f32 %v423_v51, %v422_v53  ;;  %s593_s0 = smul.f32 0.25, %s2026_s22  ;;  %s2051_s22 = sld [smem:[#allocation2 + $0x282]] }
 0x20b   :  { %v414_v56 = vadd.f32 %v413_v54, %v412_v52  ;;  %v425_v57 = vrot.slane %v424_v55, 4  ;;  %s594_s30 = smul.f32 %s2027_s27, %s593_s0  ;;  %s2123_s0 = sld [smem:[#allocation2 + $0x84]] }
 0x20d   :  { %v415_v58 = vrot.slane %v414_v56, 2  ;;  %v426_v59 = vadd.f32 %v425_v57, %v424_v55  ;;  %v567_v57 = vmul.f32 0.5, %v565_v9 }
 0x20f   :  { %v416_v60 = vadd.f32 %v415_v58, %v414_v56  ;;  %v427_v61 = vrot.slane %v426_v59, 2 }
 0x211   :  { %v417_v62 = vrot.slane %v416_v60, 1  ;;  %v428_v63 = vadd.f32 %v427_v61, %v426_v59 }
 0x213   :  { %v418_v0 = vadd.f32 %v417_v62, %v416_v60  ;;  %v429_v1 = vrot.slane %v428_v63, 1 }
 0x215   :  { %v419_v2 = vmul.f32 0.0625, %v418_v0  ;;  %v430_v3 = vadd.f32 %v429_v1, %v428_v63  ;;  %v131_v0 = vstv %s130_s4  ;;  %s2122_s4 = sld [smem:[#allocation2 + $0x4]] }
 0x217   :  { %v431_v4 = vmul.f32 0.0625, %v430_v3  ;;  %v432_v5 = vmul.f32 %v419_v2, %v419_v2  ;;  %v434_v6 = vsub.f32 %v400_v47, %v419_v2  ;;  %v435_v8 = vsub.f32 %v405_v45, %v419_v2 }
 0x218   :  { %v96_v45 = vmul.f32 %v94_v19, %v92_v39 }
 0x219   :  { %v433_v11 = vsub.f32 %v431_v4, %v432_v5  ;;  %v577_v4 = vstv %s2022_s3  ;;  %v569_v5 = vmul.f32 %v567_v57, %v565_v9  ;;  %s2750_s3 = sld [smem:[#allocation2 + $0x183]] }
 0x21a   :  { %v106_v47 = vadd.f32 %v2582_v38, %v96_v45  ;;  %v601_v38 = vstv %s600_s29 }
 0x21b   :  { %v436_v14 = vadd.f32 1e-05, %v433_v11  ;;  %v603_v52 = vadd.f32 %v601_v38, %v599_v35 }
 0x21c   :  { %v109_v48 = vmul.f32 %v2507_v25, %v106_v47  ;;  %v582_v25 = vmul.f32 0.25, %v2028_v17  ;;  %v2062_v47 = vld [vmem:[%s2984_s9 + $0x18] sm:$0xff] }
 0x21d   :  { %2339 = vrsqrt.f32 %v436_v14  ;;  %v605_v60 = vadd.f32 %v603_v52, %v557_v37 }
 0x21e   :  { %v117_v49 = vsub.f32 %v2588_v41, %v109_v48  ;;  %v598_v41 = vmul.f32 0.5, %v2512_v31  ;;  %v587_v51 = vrot.slane %v582_v25, %v2494_v13  ;;  %v2063_v48 = vld [vmem:[%s2984_s9 + $0x20] sm:$0xff] }
 0x21f   :  { %s1480_s19 = smul.f32 0.6, %s2750_s3 }
 0x220   :  { %v127_v10 = vadd.f32 %v2593_v7, %v117_v49  ;;  %v566_v7 = vsub.f32 %v563_v44, %v564_v30  ;;  %v602_v54 = vadd.f32 %v601_v38, %v598_v41  ;;  %v2312_v49 = vpack.c.bf16 %v2063_v48, %v2062_v47 }
 0x222   :  { %v568_v55 = vmul.f32 0.5, %v566_v7  ;;  %v604_v63 = vadd.f32 %v602_v54, %v557_v37  ;;  %2313 = vmatprep.subr.bf16.mxu0 %v2312_v49 }
 0x224   :  { %v570_v1 = vmul.f32 %v568_v55, %v566_v7 }
 0x227   :  { %v2340_v15 = vpop.eup %2339 }
 0x228   :  { %v438_v20 = vmul.f32 %v2340_v15, %v434_v6  ;;  %v439_v21 = vmul.f32 %v2340_v15, %v435_v8 }
 0x22a   :  { %v446_v23 = vmul.f32 %v2038_v18, %v438_v20  ;;  %v447_v24 = vmul.f32 %v2038_v18, %v439_v21  ;;  %v133_v20 = vadd.f32 %v131_v0, %v2597_v42 }
 0x22c   :  { %v454_v26 = vadd.f32 %v2039_v22, %v446_v23  ;;  %v455_v27 = vadd.f32 %v2039_v22, %v447_v24  ;;  %v132_v23 = vadd.f32 %v131_v0, %v127_v10  ;;  %v2064_v10 = vld [vmem:[%s2984_s9 + $0x28] sm:$0x3] }
 0x22e   :  { %v456_v28 = vmax.f32 %v454_v26, 0.0  ;;  %v457_v29 = vmax.f32 %v455_v27, 0.0 }
 0x230   :  { %2232 = vmatprep.mubr.msk.f32.mxu0 %vm263_vm2, %v456_v28 }
 0x231   :  { %2233 = vmatmul.mubr.msk.f32.vlgmr.msra.gmra.mrb[2].mxu0 %vm263_vm2, %v457_v29 }
 0x232   :  { %2315 = vmatpush3.bf16.msra.mxu0 %v2312_v49 }
 0x233   :  { %2244 = vmatprep.subr.msk.mxu0 %vm329_vm1, %v2064_v10 }
 0x236   :  { %2245 = vmatpush3.msk.msra.mxu0 %vm329_vm1, %v2064_v10 }
 0x304   :  { %v2234_v53 = vpop.f32.mrb[2].mxu0 }
 0x305   :  { %v549_v32 = vadd.f32 %v2234_v53, %v2040_v50  ;;  %v543_v56 = vpop.f32.mrb[3].mxu0 }
 0x306   :  { %v544_v31 = vadd.f32 %v2040_v50, %v543_v56 }
 0x307   :  { %v553_v58 = vmul.f32 -0.8888889, %v549_v32  ;;  %v590_v59 = vmul.f32 %v587_v51, %v549_v32 }
 0x308   :  { %v552_v61 = vmul.f32 -0.8888889, %v544_v31  ;;  %v589_v62 = vmul.f32 %v587_v51, %v544_v31 }
 0x309   :  { %v572_v2 = vmul.f32 0.45, %v553_v58  ;;  %v607_v3 = vmul.f32 0.8, %v553_v58 }
 0x30a   :  { %v571_v6 = vmul.f32 0.45, %v552_v61  ;;  %v606_v8 = vmul.f32 0.8, %v552_v61 }
 0x30b   :  { %v574_v11 = vmul.f32 %v572_v2, %v553_v58  ;;  %v609_v14 = vadd.f32 %v607_v3, %v605_v60 }
 0x30c   :  { %v573_v15 = vmul.f32 %v571_v6, %v552_v61  ;;  %v608_v18 = vadd.f32 %v606_v8, %v604_v63 }
 0x30d   :  { %v576_v21 = vadd.f32 %v574_v11, %v570_v1  ;;  %v611_v22 = vmul.f32 %v609_v14, %v577_v4  ;;  %v2060_v11 = vld [vmem:[%s2982_s7 + $0x1] ss:$0 sm:$0xff] }
 0x30e   :  { %v575_v24 = vadd.f32 %v573_v15, %v569_v5  ;;  %v610_v26 = vmul.f32 %v608_v18, %v577_v4  ;;  %v2061_v18 = vld [vmem:[%s2983_s8 + $0x1] ss:$0 sm:$0xff] }
 0x30f   :  { %v579_v27 = vmul.f32 %v577_v4, %v576_v21  ;;  %v2649_v28 = vadd.f32 %v611_v22, %v587_v51 }
 0x310   :  { %v578_v29 = vmul.f32 %v577_v4, %v575_v24  ;;  %v2651_v33 = vadd.f32 %v610_v26, %v587_v51 }
 0x311   :  { %v581_v36 = vsub.f32 %v133_v20, %v579_v27  ;;  %2045 = vst.msk [vmem:[%s2992_s17 + $0x28] sm:$0xff] %vm68_vm0, %v2649_v28  ;;  %v1015_v42 = vmul.f32 1.1, %v2649_v28  ;;  %v2074_v27 = vld [vmem:[%s2988_s13 + $0x18] sm:$0xff] }
 0x312   :  { %v580_v37 = vsub.f32 %v132_v23, %v578_v29  ;;  %2044 = vst.msk [vmem:[%s2992_s17 + $0x20] sm:$0xff] %vm68_vm0, %v2651_v33  ;;  %2237 = vmatprep.mubr.msk.f32.mxu1 %vm68_vm0, %v2651_v33  ;;  %v1014_v39 = vmul.f32 1.1, %v2651_v33  ;;  %v2075_v29 = vld [vmem:[%s2988_s13 + $0x20] sm:$0xff] }
 0x313   :  { %v2669_v12 = vadd.f32 %v590_v59, %v581_v36  ;;  %2238 = vmatmul.mubr.msk.f32.vlgmr.msra.gmra.mrb[2].mxu1 %vm68_vm0, %v2649_v28  ;;  %v1019_v19 = vsub.f32 %v1015_v42, %v2653_v34  ;;  %v2316_v36 = vpack.c.bf16 %v2075_v29, %v2074_v27  ;;  %v2076_v42 = vld [vmem:[%s2988_s13 + $0x28] sm:$0x3] }
 0x314   :  { %v2674_v43 = vadd.f32 %v589_v62, %v580_v37  ;;  %v1018_v44 = vsub.f32 %v1014_v39, %v2653_v34  ;;  %v2066_v37 = vld [vmem:[%s2985_s10 + $0x1] ss:$0 sm:$0xff] }
 0x315   :  { %v2677_v45 = vsub.f32 %v1019_v19, %v1021_v40  ;;  %2317 = vmatprep.subr.bf16.mxu1 %v2316_v36 }
 0x316   :  { %v2679_v46 = vsub.f32 %v1018_v44, %v1021_v40  ;;  %2319 = vmatpush3.bf16.msra.mxu1 %v2316_v36 }
 0x317   :  { %2253 = vmatprep.subr.msk.mxu1 %vm329_vm1, %v2076_v42 }
 0x31a   :  { %2254 = vmatpush3.msk.msra.mxu1 %vm329_vm1, %v2076_v42 }
 0x3e6   :  { %v2239_v17 = vpop.f32.mrb[2].mxu1 }
 0x3e7   :  { %v713_v30 = vadd.f32 %v2239_v17, %v2055_v16  ;;  %v707_v25 = vpop.f32.mrb[3].mxu1 }
 0x3e8   :  { %v708_v35 = vadd.f32 %v2055_v16, %v707_v25 }
 0x3e9   :  { %v721_v38 = vsel %vm263_vm2, %v713_v30, 0.0  ;;  %v731_v41 = vmul.f32 %v713_v30, %v713_v30 }
 0x3ea   :  { %v720_v7 = vsel %vm263_vm2, %v708_v35, 0.0  ;;  %v730_v50 = vmul.f32 %v708_v35, %v708_v35 }
 0x3eb   :  { %v733_v9 = vsel %vm263_vm2, %v731_v41, 0.0  ;;  %v722_v51 = vadd.f32 %v721_v38, %v720_v7 }
 0x3ec   :  { %v732_v52 = vsel %vm263_vm2, %v730_v50, 0.0 }
 0x3ed   :  { %v723_v53 = vrot.slane %v722_v51, 4  ;;  %v734_v54 = vadd.f32 %v733_v9, %v732_v52 }
 0x3ef   :  { %v724_v32 = vadd.f32 %v723_v53, %v722_v51  ;;  %v735_v55 = vrot.slane %v734_v54, 4 }
 0x3f1   :  { %v725_v56 = vrot.slane %v724_v32, 2  ;;  %v736_v31 = vadd.f32 %v735_v55, %v734_v54 }
 0x3f3   :  { %v726_v57 = vadd.f32 %v725_v56, %v724_v32  ;;  %v737_v58 = vrot.slane %v736_v31, 2 }
 0x3f5   :  { %v727_v59 = vrot.slane %v726_v57, 1  ;;  %v738_v60 = vadd.f32 %v737_v58, %v736_v31 }
 0x3f7   :  { %v728_v61 = vadd.f32 %v727_v59, %v726_v57  ;;  %v739_v62 = vrot.slane %v738_v60, 1 }
 0x3f9   :  { %v729_v63 = vmul.f32 0.0625, %v728_v61  ;;  %v740_v0 = vadd.f32 %v739_v62, %v738_v60 }
 0x3fb   :  { %v741_v1 = vmul.f32 0.0625, %v740_v0  ;;  %v742_v2 = vmul.f32 %v729_v63, %v729_v63  ;;  %v744_v3 = vsub.f32 %v708_v35, %v729_v63  ;;  %v745_v4 = vsub.f32 %v713_v30, %v729_v63  ;;  %v2072_v63 = vld [vmem:[%s2986_s11 + $0x1] ss:$0 sm:$0xff] }
 0x3fd   :  { %v743_v5 = vsub.f32 %v741_v1, %v742_v2  ;;  %v2073_v2 = vld [vmem:[%s2987_s12 + $0x1] ss:$0 sm:$0xff] }
 0x3ff   :  { %v746_v6 = vadd.f32 1e-05, %v743_v5 }
 0x401   :  { %2341 = vrsqrt.f32 %v746_v6 }
 0x40b   :  { %v2342_v8 = vpop.eup %2341 }
 0x40c   :  { %v748_v14 = vmul.f32 %v2342_v8, %v744_v3  ;;  %v749_v15 = vmul.f32 %v2342_v8, %v745_v4 }
 0x40e   :  { %v756_v20 = vmul.f32 %v2060_v11, %v748_v14  ;;  %v757_v21 = vmul.f32 %v2060_v11, %v749_v15  ;;  %v2091_v14 = vld [vmem:[%s2980_s5 + $0x10] sm:$0xff]  ;;  %v2052_v15 = vld [vmem:[%s2977_s2 + $0x2] sm:$0x1] }
 0x40f   :  { %2258 = vmatprep.subr.mxu0 %v2091_v14 }
 0x410   :  { %v764_v22 = vadd.f32 %v2061_v18, %v756_v20  ;;  %v765_v23 = vadd.f32 %v2061_v18, %v757_v21  ;;  %v1042_v18 = vmul.f32 0.25, %v2052_v15  ;;  %v1024_v20 = vstv %s2048_s21  ;;  %s1520_s21 = smul.f32 0.2, %s2750_s3 }
 0x411   :  { %v1059_v21 = vmul.f32 0.5, %v2649_v28  ;;  %v1025_v36 = vsub.f32 %v2679_v46, %v1024_v20 }
 0x412   :  { %v766_v24 = vmax.f32 %v764_v22, 0.0  ;;  %v767_v26 = vmax.f32 %v765_v23, 0.0  ;;  %v2078_v22 = vld [vmem:[%s2989_s14 + $0x1] ss:$0 sm:$0xff]  ;;  %v1061_v23 = vstv %s1060_s26  ;;  %v1047_v27 = vrot.slane %v1042_v18, %v2494_v13 }
 0x413   :  { %v1063_v28 = vadd.f32 %v1061_v23, %v1059_v21 }
 0x414   :  { %2246 = vmatprep.mubr.msk.f32.mxu0 %vm263_vm2, %v766_v24  ;;  %v1058_v24 = vmul.f32 0.5, %v2651_v33 }
 0x415   :  { %2247 = vmatmul.mubr.msk.f32.vlgmr.msra.gmra.mrb[4].mxu0 %vm263_vm2, %v767_v26  ;;  %v1026_v26 = vsub.f32 %v2677_v45, %v1024_v20  ;;  %v1065_v46 = vadd.f32 %v1063_v28, %v2653_v34 }
 0x416   :  { %2259 = vmatpush3.msra.mxu0 %v2091_v14  ;;  %v2093_v14 = vld [vmem:[%s2981_s6 + $0x2] ss:$0 sm:$0xff] }
 0x4e8   :  { %v2248_v39 = vpop.f32.mrb[4].mxu0 }
 0x4e9   :  { %v861_v40 = vadd.f32 %v2248_v39, %v2066_v37  ;;  %v855_v19 = vpop.f32.mrb[5].mxu0 }
 0x4ea   :  { %v856_v44 = vadd.f32 %v2066_v37, %v855_v19 }
 0x4eb   :  { %v869_v47 = vsel %vm263_vm2, %v861_v40, 0.0  ;;  %v879_v48 = vmul.f32 %v861_v40, %v861_v40 }
 0x4ec   :  { %v868_v49 = vsel %vm263_vm2, %v856_v44, 0.0  ;;  %v878_v10 = vmul.f32 %v856_v44, %v856_v44 }
 0x4ed   :  { %v881_v16 = vsel %vm263_vm2, %v879_v48, 0.0  ;;  %v870_v17 = vadd.f32 %v869_v47, %v868_v49  ;;  %v1027_v48 = vmul.f32 0.5, %v1025_v36 }
 0x4ee   :  { %v880_v30 = vsel %vm263_vm2, %v878_v10, 0.0 }
 0x4ef   :  { %v871_v25 = vrot.slane %v870_v17, 4  ;;  %v882_v35 = vadd.f32 %v881_v16, %v880_v30  ;;  %v1037_v16 = vstv %s2046_s28 }
 0x4f1   :  { %v872_v38 = vadd.f32 %v871_v25, %v870_v17  ;;  %v883_v41 = vrot.slane %v882_v35, 4 }
 0x4f3   :  { %v873_v7 = vrot.slane %v872_v38, 2  ;;  %v884_v50 = vadd.f32 %v883_v41, %v882_v35 }
 0x4f5   :  { %v874_v9 = vadd.f32 %v873_v7, %v872_v38  ;;  %v885_v51 = vrot.slane %v884_v50, 2  ;;  %v595_v7 = vstv %s594_s30  ;;  %s1936_s30 = smul.f32 0.3, %s2123_s0 }
 0x4f7   :  { %v875_v52 = vrot.slane %v874_v9, 1  ;;  %v886_v53 = vadd.f32 %v885_v51, %v884_v50  ;;  %v1029_v50 = vmul.f32 %v1027_v48, %v1025_v36 }
 0x4f9   :  { %v876_v54 = vadd.f32 %v875_v52, %v874_v9  ;;  %v887_v32 = vrot.slane %v886_v53, 1 }
 0x4fb   :  { %v877_v55 = vmul.f32 0.0625, %v876_v54  ;;  %v888_v56 = vadd.f32 %v887_v32, %v886_v53 }
 0x4fd   :  { %v889_v31 = vmul.f32 0.0625, %v888_v56  ;;  %v890_v57 = vmul.f32 %v877_v55, %v877_v55  ;;  %v892_v58 = vsub.f32 %v856_v44, %v877_v55  ;;  %v893_v59 = vsub.f32 %v861_v40, %v877_v55 }
 0x4fe   :  { %v1062_v40 = vadd.f32 %v1061_v23, %v1058_v24  ;;  %v1028_v44 = vmul.f32 0.5, %v1026_v26  ;;  %v597_v55 = vadd.f32 %v595_v7, %v2669_v12 }
 0x4ff   :  { %v891_v60 = vsub.f32 %v889_v31, %v890_v57 }
 0x500   :  { %v1064_v30 = vadd.f32 %v1062_v40, %v2653_v34  ;;  %v1030_v35 = vmul.f32 %v1028_v44, %v1026_v26  ;;  %v596_v34 = vadd.f32 %v595_v7, %v2674_v43  ;;  %v2098_v7 = vld [vmem:[%s2982_s7 + $0x2] ss:$0 sm:$0xff] }
 0x501   :  { %v894_v61 = vadd.f32 1e-05, %v891_v60 }
 0x503   :  { %2343 = vrsqrt.f32 %v894_v61 }
 0x50d   :  { %v2344_v62 = vpop.eup %2343 }
 0x50e   :  { %v896_v0 = vmul.f32 %v2344_v62, %v892_v58  ;;  %v897_v1 = vmul.f32 %v2344_v62, %v893_v59  ;;  %v2762_v59 = vstv %s1476_s18  ;;  %v1481_v62 = vstv %s1480_s19  ;;  %s2086_s18 = sld [smem:[#allocation2 + $0x103]]  ;;  %s2050_s19 = sld [smem:[#allocation2 + $0x202]] }
 0x510   :  { %v904_v3 = vmul.f32 %v2072_v63, %v896_v0  ;;  %v905_v4 = vmul.f32 %v2072_v63, %v897_v1 }
 0x512   :  { %v912_v5 = vadd.f32 %v2073_v2, %v904_v3  ;;  %v913_v6 = vadd.f32 %v2073_v2, %v905_v4 }
 0x514   :  { %v914_v8 = vmax.f32 %v912_v5, 0.0  ;;  %v915_v11 = vmax.f32 %v913_v6, 0.0  ;;  %v2100_v5 = vld [vmem:[%s2984_s9 + $0x30] sm:$0xff]  ;;  %v2101_v6 = vld [vmem:[%s2984_s9 + $0x38] sm:$0xff] }
 0x516   :  { %2255 = vmatprep.mubr.msk.f32.mxu1 %vm263_vm2, %v914_v8  ;;  %v2320_v8 = vpack.c.bf16 %v2101_v6, %v2100_v5 }
 0x517   :  { %2256 = vmatmul.mubr.msk.f32.vlgmr.msra.gmra.mrb[4].mxu1 %vm263_vm2, %v915_v11  ;;  %v2102_v11 = vld [vmem:[%s2984_s9 + $0x40] sm:$0x3] }
 0x518   :  { %2321 = vmatprep.subr.bf16.mxu1 %v2320_v8 }
 0x519   :  { %2323 = vmatpush3.bf16.msra.mxu1 %v2320_v8 }
 0x51a   :  { %2267 = vmatprep.subr.msk.mxu1 %vm329_vm1, %v2102_v11 }
 0x51d   :  { %2268 = vmatpush3.msk.msra.mxu1 %vm329_vm1, %v2102_v11 }
 0x5ea   :  { %v2257_v29 = vpop.f32.mrb[4].mxu1 }
 0x5eb   :  { %v1009_v42 = vadd.f32 %v2257_v29, %v2078_v22  ;;  %v1003_v37 = vpop.f32.mrb[5].mxu1 }
 0x5ec   :  { %v1004_v39 = vadd.f32 %v2078_v22, %v1003_v37 }
 0x5ed   :  { %v1013_v19 = vmul.f32 -0.8888889, %v1009_v42  ;;  %v1050_v47 = vmul.f32 %v1047_v27, %v1009_v42 }
 0x5ee   :  { %v1012_v33 = vmul.f32 -0.8888889, %v1004_v39  ;;  %v1049_v45 = vmul.f32 %v1047_v27, %v1004_v39 }
 0x5ef   :  { %v1032_v49 = vmul.f32 0.45, %v1013_v19  ;;  %v1067_v10 = vmul.f32 0.8, %v1013_v19 }
 0x5f0   :  { %v1031_v17 = vmul.f32 0.45, %v1012_v33  ;;  %v1066_v25 = vmul.f32 0.8, %v1012_v33 }
 0x5f1   :  { %v1034_v38 = vmul.f32 %v1032_v49, %v1013_v19  ;;  %v1069_v41 = vadd.f32 %v1067_v10, %v1065_v46 }
 0x5f2   :  { %v1033_v9 = vmul.f32 %v1031_v17, %v1012_v33  ;;  %v1068_v51 = vadd.f32 %v1066_v25, %v1064_v30 }
 0x5f3   :  { %v1036_v52 = vadd.f32 %v1034_v38, %v1030_v35  ;;  %v1071_v53 = vmul.f32 %v1069_v41, %v1037_v16 }
 0x5f4   :  { %v1035_v54 = vadd.f32 %v1033_v9, %v1029_v50  ;;  %v1070_v32 = vmul.f32 %v1068_v51, %v1037_v16  ;;  %v2099_v51 = vld [vmem:[%s2983_s8 + $0x2] ss:$0 sm:$0xff] }
 0x5f5   :  { %v1039_v56 = vmul.f32 %v1037_v16, %v1036_v52  ;;  %v2757_v31 = vadd.f32 %v1071_v53, %v1047_v27 }
 0x5f6   :  { %v1038_v57 = vmul.f32 %v1037_v16, %v1035_v54  ;;  %v2760_v58 = vadd.f32 %v1070_v32, %v1047_v27 }
 0x5f7   :  { %v1041_v60 = vsub.f32 %v597_v55, %v1039_v56  ;;  %2083 = vst.msk [vmem:[%s2992_s17 + $0x38] sm:$0xff] %vm68_vm0, %v2757_v31  ;;  %v1475_v61 = vmul.f32 1.1, %v2757_v31 }
 0x5f8   :  { %v1040_v12 = vsub.f32 %v596_v34, %v1038_v57  ;;  %2082 = vst.msk [vmem:[%s2992_s17 + $0x30] sm:$0xff] %vm68_vm0, %v2760_v58  ;;  %2260 = vmatprep.mubr.msk.f32.mxu0 %vm68_vm0, %v2760_v58  ;;  %v1474_v43 = vmul.f32 1.1, %v2760_v58  ;;  %v2112_v34 = vld [vmem:[%s2988_s13 + $0x30] sm:$0xff]  ;;  %v2113_v57 = vld [vmem:[%s2988_s13 + $0x38] sm:$0xff] }
 0x5f9   :  { %v2778_v63 = vadd.f32 %v1050_v47, %v1041_v60  ;;  %2261 = vmatmul.mubr.msk.f32.vlgmr.msra.gmra.mrb[6].mxu0 %vm68_vm0, %v2757_v31  ;;  %v1479_v0 = vsub.f32 %v1475_v61, %v2762_v59  ;;  %v2324_v60 = vpack.c.bf16 %v2113_v57, %v2112_v34  ;;  %v2114_v61 = vld [vmem:[%s2988_s13 + $0x40] sm:$0x3] }
 0x5fa   :  { %v2783_v1 = vadd.f32 %v1049_v45, %v1040_v12  ;;  %v1478_v2 = vsub.f32 %v1474_v43, %v2762_v59  ;;  %v2104_v12 = vld [vmem:[%s2985_s10 + $0x2] ss:$0 sm:$0xff] }
 0x5fb   :  { %v2786_v3 = vsub.f32 %v1479_v0, %v1481_v62  ;;  %2325 = vmatprep.subr.bf16.mxu0 %v2324_v60 }
 0x5fc   :  { %v2788_v4 = vsub.f32 %v1478_v2, %v1481_v62  ;;  %2327 = vmatpush3.bf16.msra.mxu0 %v2324_v60 }
 0x5fd   :  { %2276 = vmatprep.subr.msk.mxu0 %vm329_vm1, %v2114_v61 }
 0x600   :  { %2277 = vmatpush3.msk.msra.mxu0 %vm329_vm1, %v2114_v61 }
 0x6cc   :  { %v2262_v15 = vpop.f32.mrb[6].mxu0 }
 0x6cd   :  { %v1173_v18 = vadd.f32 %v2262_v15, %v2093_v14  ;;  %v1167_v20 = vpop.f32.mrb[7].mxu0 }
 0x6ce   :  { %v1168_v21 = vadd.f32 %v2093_v14, %v1167_v20 }
 0x6cf   :  { %v1181_v22 = vsel %vm263_vm2, %v1173_v18, 0.0  ;;  %v1191_v23 = vmul.f32 %v1173_v18, %v1173_v18 }
 0x6d0   :  { %v1180_v24 = vsel %vm263_vm2, %v1168_v21, 0.0  ;;  %v1190_v26 = vmul.f32 %v1168_v21, %v1168_v21 }
 0x6d1   :  { %v1193_v27 = vsel %vm263_vm2, %v1191_v23, 0.0  ;;  %v1182_v29 = vadd.f32 %v1181_v22, %v1180_v24 }
 0x6d2   :  { %v1192_v36 = vsel %vm263_vm2, %v1190_v26, 0.0 }
 0x6d3   :  { %v1183_v42 = vrot.slane %v1182_v29, 4  ;;  %v1194_v28 = vadd.f32 %v1193_v27, %v1192_v36 }
 0x6d5   :  { %v1184_v37 = vadd.f32 %v1183_v42, %v1182_v29  ;;  %v1195_v39 = vrot.slane %v1194_v28, 4 }
 0x6d7   :  { %v1185_v40 = vrot.slane %v1184_v37, 2  ;;  %v1196_v19 = vadd.f32 %v1195_v39, %v1194_v28 }
 0x6d9   :  { %v1186_v44 = vadd.f32 %v1185_v40, %v1184_v37  ;;  %v1197_v47 = vrot.slane %v1196_v19, 2 }
 0x6db   :  { %v1187_v33 = vrot.slane %v1186_v44, 1  ;;  %v1198_v48 = vadd.f32 %v1197_v47, %v1196_v19 }
 0x6dd   :  { %v1188_v45 = vadd.f32 %v1187_v33, %v1186_v44  ;;  %v1199_v49 = vrot.slane %v1198_v48, 1 }
 0x6df   :  { %v1189_v46 = vmul.f32 0.0625, %v1188_v45  ;;  %v1200_v10 = vadd.f32 %v1199_v49, %v1198_v48 }
 0x6e1   :  { %v1201_v16 = vmul.f32 0.0625, %v1200_v10  ;;  %v1202_v17 = vmul.f32 %v1189_v46, %v1189_v46  ;;  %v1204_v30 = vsub.f32 %v1168_v21, %v1189_v46  ;;  %v1205_v25 = vsub.f32 %v1173_v18, %v1189_v46  ;;  %v2110_v46 = vld [vmem:[%s2986_s11 + $0x2] ss:$0 sm:$0xff] }
 0x6e3   :  { %v1203_v35 = vsub.f32 %v1201_v16, %v1202_v17  ;;  %v2111_v17 = vld [vmem:[%s2987_s12 + $0x2] ss:$0 sm:$0xff] }
 0x6e5   :  { %v1206_v38 = vadd.f32 1e-05, %v1203_v35 }
 0x6e7   :  { %2345 = vrsqrt.f32 %v1206_v38 }
 0x6f1   :  { %v2346_v41 = vpop.eup %2345 }
 0x6f2   :  { %v1208_v50 = vmul.f32 %v2346_v41, %v1204_v30  ;;  %v1209_v9 = vmul.f32 %v2346_v41, %v1205_v25 }
 0x6f4   :  { %v1216_v52 = vmul.f32 %v2098_v7, %v1208_v50  ;;  %v1217_v53 = vmul.f32 %v2098_v7, %v1209_v9  ;;  %v2129_v50 = vld [vmem:[%s2980_s5 + $0x18] sm:$0xff]  ;;  %v2090_v9 = vld [vmem:[%s2977_s2 + $0x3] sm:$0x1]  ;;  %s1053_s5 = smul.f32 0.25, %s2050_s19 }
 0x6f5   :  { %2281 = vmatprep.subr.mxu1 %v2129_v50  ;;  %s1980_s19 = smul.f32 0.2, %s2125_s20 }
 0x6f6   :  { %v1224_v54 = vadd.f32 %v2099_v51, %v1216_v52  ;;  %v1225_v32 = vadd.f32 %v2099_v51, %v1217_v53  ;;  %v1502_v51 = vmul.f32 0.25, %v2090_v9  ;;  %v1484_v52 = vstv %s2086_s18  ;;  %s1054_s3 = smul.f32 %s2051_s22, %s1053_s5  ;;  %s2088_s18 = sld [smem:[#allocation2 + $0x203]] }
 0x6f7   :  { %v1519_v53 = vmul.f32 0.5, %v2757_v31  ;;  %v1485_v60 = vsub.f32 %v2788_v4, %v1484_v52 }
 0x6f8   :  { %v1226_v55 = vmax.f32 %v1224_v54, 0.0  ;;  %v1227_v56 = vmax.f32 %v1225_v32, 0.0  ;;  %v2116_v54 = vld [vmem:[%s2989_s14 + $0x2] ss:$0 sm:$0xff]  ;;  %v1521_v32 = vstv %s1520_s21  ;;  %v1507_v34 = vrot.slane %v1502_v51, %v2494_v13  ;;  %s2939_s21 = sld [smem:[#allocation2 + $0x204]] }
 0x6fa   :  { %2269 = vmatprep.mubr.msk.f32.mxu1 %vm263_vm2, %v1226_v55  ;;  %v1518_v55 = vmul.f32 0.5, %v2760_v58 }
 0x6fb   :  { %2270 = vmatmul.mubr.msk.f32.vlgmr.msra.gmra.mrb[6].mxu1 %vm263_vm2, %v1227_v56  ;;  %v1486_v56 = vsub.f32 %v2786_v3, %v1484_v52 }
 0x6fc   :  { %2282 = vmatpush3.msra.mxu1 %v2129_v50  ;;  %s1513_s22 = smul.f32 0.25, %s2088_s18 }
 0x7ce   :  { %v2271_v43 = vpop.f32.mrb[6].mxu1 }
 0x7cf   :  { %v1321_v62 = vadd.f32 %v2271_v43, %v2104_v12  ;;  %v1315_v0 = vpop.f32.mrb[7].mxu1 }
 0x7d0   :  { %v1316_v2 = vadd.f32 %v2104_v12, %v1315_v0  ;;  %v1523_v12 = vadd.f32 %v1521_v32, %v1519_v53 }
 0x7d1   :  { %v1329_v5 = vsel %vm263_vm2, %v1321_v62, 0.0  ;;  %v1339_v6 = vmul.f32 %v1321_v62, %v1321_v62 }
 0x7d2   :  { %v1328_v8 = vsel %vm263_vm2, %v1316_v2, 0.0  ;;  %v1338_v11 = vmul.f32 %v1316_v2, %v1316_v2  ;;  %v1525_v3 = vadd.f32 %v1523_v12, %v2762_v59 }
 0x7d3   :  { %v1341_v14 = vsel %vm263_vm2, %v1339_v6, 0.0  ;;  %v1330_v15 = vadd.f32 %v1329_v5, %v1328_v8  ;;  %v1487_v8 = vmul.f32 0.5, %v1485_v60 }
 0x7d4   :  { %v1340_v18 = vsel %vm263_vm2, %v1338_v11, 0.0 }
 0x7d5   :  { %v1331_v20 = vrot.slane %v1330_v15, 4  ;;  %v1342_v21 = vadd.f32 %v1341_v14, %v1340_v18 }
 0x7d7   :  { %v1332_v22 = vadd.f32 %v1331_v20, %v1330_v15  ;;  %v1343_v23 = vrot.slane %v1342_v21, 4  ;;  %v1497_v15 = vstv %s2084_s23  ;;  %s2127_s23 = sld [smem:[#allocation2 + $0x284]] }
 0x7d9   :  { %v1333_v24 = vrot.slane %v1332_v22, 2  ;;  %v1344_v26 = vadd.f32 %v1343_v23, %v1342_v21 }
 0x7db   :  { %v1334_v27 = vadd.f32 %v1333_v24, %v1332_v22  ;;  %v1345_v29 = vrot.slane %v1344_v26, 2  ;;  %v1055_v24 = vstv %s1054_s3 }
 0x7dd   :  { %v1335_v36 = vrot.slane %v1334_v27, 1  ;;  %v1346_v42 = vadd.f32 %v1345_v29, %v1344_v26  ;;  %v1489_v26 = vmul.f32 %v1487_v8, %v1485_v60 }
 0x7df   :  { %v1336_v28 = vadd.f32 %v1335_v36, %v1334_v27  ;;  %v1347_v37 = vrot.slane %v1346_v42, 1 }
 0x7e1   :  { %v1337_v39 = vmul.f32 0.0625, %v1336_v28  ;;  %v1348_v40 = vadd.f32 %v1347_v37, %v1346_v42 }
 0x7e3   :  { %v1349_v19 = vmul.f32 0.0625, %v1348_v40  ;;  %v1350_v44 = vmul.f32 %v1337_v39, %v1337_v39  ;;  %v1352_v47 = vsub.f32 %v1316_v2, %v1337_v39  ;;  %v1353_v33 = vsub.f32 %v1321_v62, %v1337_v39 }
 0x7e4   :  { %v1522_v62 = vadd.f32 %v1521_v32, %v1518_v55  ;;  %v1488_v2 = vmul.f32 0.5, %v1486_v56  ;;  %v1057_v39 = vadd.f32 %v1055_v24, %v2778_v63 }
 0x7e5   :  { %v1351_v48 = vsub.f32 %v1349_v19, %v1350_v44  ;;  %v1056_v44 = vadd.f32 %v1055_v24, %v2783_v1 }
 0x7e6   :  { %v1524_v4 = vadd.f32 %v1522_v62, %v2762_v59  ;;  %v1490_v21 = vmul.f32 %v1488_v2, %v1486_v56 }
 0x7e7   :  { %v1354_v45 = vadd.f32 1e-05, %v1351_v48 }
 0x7e9   :  { %2347 = vrsqrt.f32 %v1354_v45  ;;  %v2138_v45 = vld [vmem:[%s2984_s9 + $0x48] sm:$0xff] }
 0x7f3   :  { %v2348_v49 = vpop.eup %2347 }
 0x7f4   :  { %v1356_v10 = vmul.f32 %v2348_v49, %v1352_v47  ;;  %v1357_v16 = vmul.f32 %v2348_v49, %v1353_v33  ;;  %v2139_v49 = vld [vmem:[%s2984_s9 + $0x50] sm:$0xff] }
 0x7f6   :  { %v1364_v30 = vmul.f32 %v2110_v46, %v1356_v10  ;;  %v1365_v25 = vmul.f32 %v2110_v46, %v1357_v16  ;;  %v2328_v46 = vpack.c.bf16 %v2139_v49, %v2138_v45  ;;  %v2140_v10 = vld [vmem:[%s2984_s9 + $0x58] sm:$0x3]  ;;  %v2131_v16 = vld [vmem:[%s2981_s6 + $0x3] ss:$0 sm:$0xff] }
 0x7f8   :  { %v1372_v35 = vadd.f32 %v2111_v17, %v1364_v30  ;;  %v1373_v38 = vadd.f32 %v2111_v17, %v1365_v25  ;;  %2329 = vmatprep.subr.bf16.mxu0 %v2328_v46 }
 0x7fa   :  { %v1374_v41 = vmax.f32 %v1372_v35, 0.0  ;;  %v1375_v7 = vmax.f32 %v1373_v38, 0.0 }
 0x7fc   :  { %2278 = vmatprep.mubr.msk.f32.mxu0 %vm263_vm2, %v1374_v41 }
 0x7fd   :  { %2279 = vmatmul.mubr.msk.f32.vlgmr.msra.gmra.mrb[8].mxu0 %vm263_vm2, %v1375_v7 }
 0x7fe   :  { %2331 = vmatpush3.bf16.msra.mxu0 %v2328_v46 }
 0x7ff   :  { %2290 = vmatprep.subr.msk.mxu0 %vm329_vm1, %v2140_v10 }
 0x802   :  { %2291 = vmatpush3.msk.msra.mxu0 %vm329_vm1, %v2140_v10 }
 0x8d0   :  { %v2280_v57 = vpop.f32.mrb[8].mxu0 }
 0x8d1   :  { %v1469_v61 = vadd.f32 %v2280_v57, %v2116_v54  ;;  %v1463_v43 = vpop.f32.mrb[9].mxu0 }
 0x8d2   :  { %v1464_v31 = vadd.f32 %v2116_v54, %v1463_v43 }
 0x8d3   :  { %v1473_v0 = vmul.f32 -0.8888889, %v1469_v61  ;;  %v1510_v5 = vmul.f32 %v1507_v34, %v1469_v61 }
 0x8d4   :  { %v1472_v6 = vmul.f32 -0.8888889, %v1464_v31  ;;  %v1509_v58 = vmul.f32 %v1507_v34, %v1464_v31 }
 0x8d5   :  { %v1492_v11 = vmul.f32 0.45, %v1473_v0  ;;  %v1527_v14 = vmul.f32 0.8, %v1473_v0 }
 0x8d6   :  { %v1491_v18 = vmul.f32 0.45, %v1472_v6  ;;  %v1526_v20 = vmul.f32 0.8, %v1472_v6 }
 0x8d7   :  { %v1494_v22 = vmul.f32 %v1492_v11, %v1473_v0  ;;  %v1529_v23 = vadd.f32 %v1527_v14, %v1525_v3  ;;  %v2136_v14 = vld [vmem:[%s2982_s7 + $0x3] ss:$0 sm:$0xff]  ;;  %s1514_s7 = smul.f32 %s2089_s1, %s1513_s22 }
 0x8d8   :  { %v1493_v27 = vmul.f32 %v1491_v18, %v1472_v6  ;;  %v1528_v29 = vadd.f32 %v1526_v20, %v1524_v4  ;;  %v2137_v4 = vld [vmem:[%s2983_s8 + $0x3] ss:$0 sm:$0xff] }
 0x8d9   :  { %v1496_v36 = vadd.f32 %v1494_v22, %v1490_v21  ;;  %v1531_v42 = vmul.f32 %v1529_v23, %v1497_v15 }
 0x8da   :  { %v1495_v28 = vadd.f32 %v1493_v27, %v1489_v26  ;;  %v1530_v37 = vmul.f32 %v1528_v29, %v1497_v15  ;;  %v2150_v27 = vld [vmem:[%s2988_s13 + $0x48] sm:$0xff]  ;;  %v2151_v29 = vld [vmem:[%s2988_s13 + $0x50] sm:$0xff] }
 0x8db   :  { %v1499_v40 = vmul.f32 %v1497_v15, %v1496_v36  ;;  %v2860_v19 = vadd.f32 %v1531_v42, %v1507_v34  ;;  %v2332_v36 = vpack.c.bf16 %v2151_v29, %v2150_v27  ;;  %v2152_v42 = vld [vmem:[%s2988_s13 + $0x58] sm:$0x3]  ;;  %v1981_v27 = vstv %s1980_s19 }
 0x8dc   :  { %v1498_v59 = vmul.f32 %v1497_v15, %v1495_v28  ;;  %v2863_v47 = vadd.f32 %v1530_v37, %v1507_v34  ;;  %v2142_v28 = vld [vmem:[%s2985_s10 + $0x3] ss:$0 sm:$0xff] }
 0x8dd   :  { %v1501_v33 = vsub.f32 %v1057_v39, %v1499_v40  ;;  %2121 = vst.msk [vmem:[%s2992_s17 + $0x48] sm:$0xff] %vm68_vm0, %v2860_v19  ;;  %2333 = vmatprep.subr.bf16.mxu1 %v2332_v36 }
 0x8de   :  { %v1500_v48 = vsub.f32 %v1056_v44, %v1498_v59  ;;  %2120 = vst.msk [vmem:[%s2992_s17 + $0x40] sm:$0xff] %vm68_vm0, %v2863_v47  ;;  %2283 = vmatprep.mubr.msk.f32.mxu1 %vm68_vm0, %v2863_v47 }
 0x8df   :  { %v2877_v63 = vadd.f32 %v1510_v5, %v1501_v33  ;;  %2284 = vmatmul.mubr.msk.f32.vlgmr.msra.gmra.mrb[8].mxu1 %vm68_vm0, %v2860_v19 }
 0x8e0   :  { %v2881_v1 = vadd.f32 %v1509_v58, %v1500_v48  ;;  %2335 = vmatpush3.bf16.msra.mxu1 %v2332_v36 }
 0x8e1   :  { %2299 = vmatprep.subr.msk.mxu1 %vm329_vm1, %v2152_v42 }
 0x8e4   :  { %2300 = vmatpush3.msk.msra.mxu1 %vm329_vm1, %v2152_v42 }
 0x9b2   :  { %v2285_v17 = vpop.f32.mrb[8].mxu1 }
 0x9b3   :  { %v1633_v30 = vadd.f32 %v2285_v17, %v2131_v16  ;;  %v1627_v25 = vpop.f32.mrb[9].mxu1 }
 0x9b4   :  { %v1628_v35 = vadd.f32 %v2131_v16, %v1627_v25 }
 0x9b5   :  { %v1641_v38 = vsel %vm263_vm2, %v1633_v30, 0.0  ;;  %v1651_v41 = vmul.f32 %v1633_v30, %v1633_v30 }
 0x9b6   :  { %v1640_v7 = vsel %vm263_vm2, %v1628_v35, 0.0  ;;  %v1650_v50 = vmul.f32 %v1628_v35, %v1628_v35 }
 0x9b7   :  { %v1653_v9 = vsel %vm263_vm2, %v1651_v41, 0.0  ;;  %v1642_v51 = vadd.f32 %v1641_v38, %v1640_v7 }
 0x9b8   :  { %v1652_v52 = vsel %vm263_vm2, %v1650_v50, 0.0 }
 0x9b9   :  { %v1643_v53 = vrot.slane %v1642_v51, 4  ;;  %v1654_v54 = vadd.f32 %v1653_v9, %v1652_v52 }
 0x9bb   :  { %v1644_v32 = vadd.f32 %v1643_v53, %v1642_v51  ;;  %v1655_v55 = vrot.slane %v1654_v54, 4 }
 0x9bd   :  { %v1645_v56 = vrot.slane %v1644_v32, 2  ;;  %v1656_v34 = vadd.f32 %v1655_v55, %v1654_v54 }
 0x9bf   :  { %v1646_v57 = vadd.f32 %v1645_v56, %v1644_v32  ;;  %v1657_v60 = vrot.slane %v1656_v34, 2 }
 0x9c1   :  { %v1647_v61 = vrot.slane %v1646_v57, 1  ;;  %v1658_v12 = vadd.f32 %v1657_v60, %v1656_v34 }
 0x9c3   :  { %v1648_v43 = vadd.f32 %v1647_v61, %v1646_v57  ;;  %v1659_v31 = vrot.slane %v1658_v12, 1 }
 0x9c5   :  { %v1649_v62 = vmul.f32 0.0625, %v1648_v43  ;;  %v1660_v0 = vadd.f32 %v1659_v31, %v1658_v12  ;;  %v2148_v12 = vld [vmem:[%s2986_s11 + $0x3] ss:$0 sm:$0xff]  ;;  %s2124_s11 = sld [smem:[#allocation2 + $0x104]] }
 0x9c7   :  { %v1661_v2 = vmul.f32 0.0625, %v1660_v0  ;;  %v1662_v5 = vmul.f32 %v1649_v62, %v1649_v62  ;;  %v1664_v6 = vsub.f32 %v1628_v35, %v1649_v62  ;;  %v1665_v8 = vsub.f32 %v1633_v30, %v1649_v62  ;;  %v2149_v62 = vld [vmem:[%s2987_s12 + $0x3] ss:$0 sm:$0xff]  ;;  %s1940_s12 = smul.f32 0.6, %s2125_s20 }
 0x9c9   :  { %v1663_v58 = vsub.f32 %v1661_v2, %v1662_v5 }
 0x9cb   :  { %v1666_v11 = vadd.f32 1e-05, %v1663_v58 }
 0x9cd   :  { %2349 = vrsqrt.f32 %v1666_v11  ;;  %v1935_v11 = vmul.f32 1.1, %v2860_v19 }
 0x9d7   :  { %v2350_v3 = vpop.eup %2349 }
 0x9d8   :  { %v1668_v15 = vmul.f32 %v2350_v3, %v1664_v6  ;;  %v1669_v18 = vmul.f32 %v2350_v3, %v1665_v8  ;;  %v1934_v3 = vmul.f32 1.1, %v2863_v47 }
 0x9da   :  { %v1676_v20 = vmul.f32 %v2136_v14, %v1668_v15  ;;  %v1677_v21 = vmul.f32 %v2136_v14, %v1669_v18  ;;  %v1937_v14 = vstv %s1936_s30  ;;  %v1941_v18 = vstv %s1940_s12 }
 0x9db   :  { %v1939_v15 = vsub.f32 %v1935_v11, %v1937_v14 }
 0x9dc   :  { %v1684_v22 = vadd.f32 %v2137_v4, %v1676_v20  ;;  %v1685_v23 = vadd.f32 %v2137_v4, %v1677_v21  ;;  %v1938_v4 = vsub.f32 %v1934_v3, %v1937_v14  ;;  %v1944_v21 = vstv %s2124_s11 }
 0x9dd   :  { %v1943_v20 = vsub.f32 %v1939_v15, %v1941_v18 }
 0x9de   :  { %v1686_v24 = vmax.f32 %v1684_v22, 0.0  ;;  %v1687_v26 = vmax.f32 %v1685_v23, 0.0  ;;  %v1942_v22 = vsub.f32 %v1938_v4, %v1941_v18  ;;  %v1979_v23 = vmul.f32 0.5, %v2860_v19  ;;  %v2128_v19 = vld [vmem:[%s2977_s2 + $0x4] sm:$0x1] }
 0x9df   :  { %v1946_v29 = vsub.f32 %v1943_v20, %v1944_v21 }
 0x9e0   :  { %2292 = vmatprep.mubr.msk.f32.mxu0 %vm263_vm2, %v1686_v24  ;;  %v1978_v24 = vmul.f32 0.5, %v2863_v47  ;;  %v1945_v42 = vsub.f32 %v1942_v22, %v1944_v21 }
 0x9e1   :  { %2293 = vmatmul.mubr.msk.f32.vlgmr.msra.gmra.mrb[10].mxu0 %vm263_vm2, %v1687_v26  ;;  %v2154_v26 = vld [vmem:[%s2989_s14 + $0x3] ss:$0 sm:$0xff]  ;;  %s1973_s14 = smul.f32 0.25, %s2939_s21 }
 0x9e3   :  { %s1974_s2 = smul.f32 %s2127_s23, %s1973_s14 }
 0xab4   :  { %v2294_v37 = vpop.f32.mrb[10].mxu0 }
 0xab5   :  { %v1781_v39 = vadd.f32 %v2294_v37, %v2142_v28  ;;  %v1775_v40 = vpop.f32.mrb[11].mxu0  ;;  %v1983_v37 = vadd.f32 %v1981_v27, %v1979_v23 }
 0xab6   :  { %v1776_v44 = vadd.f32 %v2142_v28, %v1775_v40  ;;  %v1982_v40 = vadd.f32 %v1981_v27, %v1978_v24 }
 0xab7   :  { %v1789_v59 = vsel %vm263_vm2, %v1781_v39, 0.0  ;;  %v1799_v33 = vmul.f32 %v1781_v39, %v1781_v39 }
 0xab8   :  { %v1788_v48 = vsel %vm263_vm2, %v1776_v44, 0.0  ;;  %v1798_v45 = vmul.f32 %v1776_v44, %v1776_v44 }
 0xab9   :  { %v1801_v49 = vsel %vm263_vm2, %v1799_v33, 0.0  ;;  %v1790_v46 = vadd.f32 %v1789_v59, %v1788_v48  ;;  %v1948_v59 = vmul.f32 0.5, %v1946_v29  ;;  %v1947_v48 = vmul.f32 0.5, %v1945_v42 }
 0xaba   :  { %v1800_v10 = vsel %vm263_vm2, %v1798_v45, 0.0 }
 0xabb   :  { %v1791_v16 = vrot.slane %v1790_v46, 4  ;;  %v1802_v17 = vadd.f32 %v1801_v49, %v1800_v10  ;;  %v1962_v49 = vmul.f32 0.25, %v2128_v19 }
 0xabd   :  { %v1792_v30 = vadd.f32 %v1791_v16, %v1790_v46  ;;  %v1803_v25 = vrot.slane %v1802_v17, 4  ;;  %v1985_v46 = vadd.f32 %v1983_v37, %v1937_v14  ;;  %v1957_v16 = vstv %s2122_s4 }
 0xabf   :  { %v1793_v35 = vrot.slane %v1792_v30, 2  ;;  %v1804_v38 = vadd.f32 %v1803_v25, %v1802_v17 }
 0xac1   :  { %v1794_v41 = vadd.f32 %v1793_v35, %v1792_v30  ;;  %v1805_v7 = vrot.slane %v1804_v38, 2  ;;  %v1984_v30 = vadd.f32 %v1982_v40, %v1937_v14  ;;  %v1950_v35 = vmul.f32 %v1948_v59, %v1946_v29 }
 0xac3   :  { %v1795_v50 = vrot.slane %v1794_v41, 1  ;;  %v1806_v9 = vadd.f32 %v1805_v7, %v1804_v38  ;;  %v1515_v7 = vstv %s1514_s7 }
 0xac5   :  { %v1796_v51 = vadd.f32 %v1795_v50, %v1794_v41  ;;  %v1807_v52 = vrot.slane %v1806_v9, 1  ;;  %v1949_v50 = vmul.f32 %v1947_v48, %v1945_v42 }
 0xac7   :  { %v1797_v53 = vmul.f32 0.0625, %v1796_v51  ;;  %v1808_v54 = vadd.f32 %v1807_v52, %v1806_v9 }
 0xac9   :  { %v1809_v32 = vmul.f32 0.0625, %v1808_v54  ;;  %v1810_v55 = vmul.f32 %v1797_v53, %v1797_v53  ;;  %v1812_v56 = vsub.f32 %v1776_v44, %v1797_v53  ;;  %v1813_v34 = vsub.f32 %v1781_v39, %v1797_v53 }
 0xaca   :  { %v1967_v53 = vrot.slane %v1962_v49, %v2494_v13  ;;  %v1975_v13 = vstv %s1974_s2 }
 0xacb   :  { %v1811_v57 = vsub.f32 %v1809_v32, %v1810_v55 }
 0xacd   :  { %v1814_v60 = vadd.f32 1e-05, %v1811_v57 }
 0xacf   :  { %2351 = vrsqrt.f32 %v1814_v60  ;;  %v1516_v60 = vadd.f32 %v1515_v7, %v2881_v1 }
 0xad9   :  { %v2352_v61 = vpop.eup %2351 }
 0xada   :  { %v1816_v43 = vmul.f32 %v2352_v61, %v1812_v56  ;;  %v1817_v31 = vmul.f32 %v2352_v61, %v1813_v34  ;;  %v1517_v56 = vadd.f32 %v1515_v7, %v2877_v63 }
 0xadc   :  { %v1824_v0 = vmul.f32 %v2148_v12, %v1816_v43  ;;  %v1825_v2 = vmul.f32 %v2148_v12, %v1817_v31 }
 0xade   :  { %v1832_v5 = vadd.f32 %v2149_v62, %v1824_v0  ;;  %v1833_v6 = vadd.f32 %v2149_v62, %v1825_v2 }
 0xae0   :  { %v1834_v8 = vmax.f32 %v1832_v5, 0.0  ;;  %v1835_v58 = vmax.f32 %v1833_v6, 0.0 }
 0xae2   :  { %2301 = vmatprep.mubr.msk.f32.mxu1 %vm263_vm2, %v1834_v8 }
 0xae3   :  { %2302 = vmatmul.mubr.msk.f32.vlgmr.msra.gmra.mrb[10].mxu1 %vm263_vm2, %v1835_v58 }
 0xbb6   :  { %v2303_v36 = vpop.f32.mrb[10].mxu1 }
 0xbb7   :  { %v1929_v28 = vadd.f32 %v2303_v36, %v2154_v26  ;;  %v1923_v39 = vpop.f32.mrb[11].mxu1 }
 0xbb8   :  { %v1924_v47 = vadd.f32 %v2154_v26, %v1923_v39 }
 0xbb9   :  { %v1933_v44 = vmul.f32 -0.8888889, %v1929_v28  ;;  %v1970_v31 = vmul.f32 %v1967_v53, %v1929_v28 }
 0xbba   :  { %v1932_v33 = vmul.f32 -0.8888889, %v1924_v47  ;;  %v1969_v62 = vmul.f32 %v1967_v53, %v1924_v47 }
 0xbbb   :  { %v1952_v45 = vmul.f32 0.45, %v1933_v44  ;;  %v1987_v10 = vmul.f32 0.8, %v1933_v44 }
 0xbbc   :  { %v1951_v17 = vmul.f32 0.45, %v1932_v33  ;;  %v1986_v25 = vmul.f32 0.8, %v1932_v33 }
 0xbbd   :  { %v1954_v38 = vmul.f32 %v1952_v45, %v1933_v44  ;;  %v1989_v41 = vadd.f32 %v1987_v10, %v1985_v46 }
 0xbbe   :  { %v1953_v9 = vmul.f32 %v1951_v17, %v1932_v33  ;;  %v1988_v51 = vadd.f32 %v1986_v25, %v1984_v30 }
 0xbbf   :  { %v1956_v52 = vadd.f32 %v1954_v38, %v1950_v35  ;;  %v1991_v54 = vmul.f32 %v1989_v41, %v1957_v16 }
 0xbc0   :  { %v1955_v32 = vadd.f32 %v1953_v9, %v1949_v50  ;;  %v1990_v55 = vmul.f32 %v1988_v51, %v1957_v16 }
 0xbc1   :  { %v1959_v34 = vmul.f32 %v1957_v16, %v1956_v52  ;;  %v1993_v57 = vadd.f32 %v1991_v54, %v1967_v53 }
 0xbc2   :  { %v1958_v61 = vmul.f32 %v1957_v16, %v1955_v32  ;;  %v1992_v12 = vadd.f32 %v1990_v55, %v1967_v53 }
 0xbc3   :  { %v1961_v43 = vsub.f32 %v1517_v56, %v1959_v34  ;;  %2159 = vst.msk [vmem:[%s2992_s17 + $0x58] sm:$0xff] %vm68_vm0, %v1993_v57  ;;  %2000 = vst.msk [vmem:[%s2991_s16 + $0x8] sm:$0xff] %vm68_vm0, %v1993_v57 }
 0xbc4   :  { %v1960_v63 = vsub.f32 %v1516_v60, %v1958_v61  ;;  %2158 = vst.msk [vmem:[%s2992_s17 + $0x50] sm:$0xff] %vm68_vm0, %v1992_v12  ;;  %1999 = vst.msk [vmem:[%s2991_s16] sm:$0xff] %vm68_vm0, %v1992_v12 }
 0xbc5   :  { %v1972_v1 = vadd.f32 %v1970_v31, %v1961_v43 }
 0xbc6   :  { %v1971_v0 = vadd.f32 %v1969_v62, %v1960_v63 }
 0xbc7   :  { %v1977_v2 = vadd.f32 %v1975_v13, %v1972_v1 }
 0xbc8   :  { %v1976_v5 = vadd.f32 %v1975_v13, %v1971_v0 }
 0xbc9   :  { %1998 = vst.msk [vmem:[%s2990_s15 + $0x8] sm:$0xff] %vm68_vm0, %v1977_v2 }
 0xbca   :  { %1997 = vst.msk [vmem:[%s2990_s15] sm:$0xff] %vm68_vm0, %v1976_v5 }
 0xbcb   :  { %2013 = vsyncpa [#allocation3], 1 }

</bundles_post_ra>
